<compile_context>
chip_gen: v7x
topology: tpu7x:2x2x1
jax: 0.10.0
libtpu: 0.0.40
codegen_flags: <defaults>
</compile_context>

<pallas_src>
import functools

import jax
import jax.numpy as jnp
from jax.experimental import pallas as pl
from jax.experimental.pallas import tpu as pltpu

Block_dimension = 256

_MIB = 1024 * 1024


@functools.lru_cache(maxsize=None)
def _tpu_config():
    """Generation-aware (vmem_limit_bytes, tile_budget_bytes, multi_core)."""
    cap = 128 * _MIB
    n_cores = 1
    try:
        info = pltpu.get_tpu_info()
        cap = int(getattr(info, "vmem_capacity_bytes", cap))
        n_cores = int(getattr(info, "num_cores",
                              getattr(info, "tensorcores_per_chip", 1)) or 1)
    except Exception:
        pass
    if cap <= 80 * _MIB:
        # v7x-class: 64 MiB VMEM per TensorCore, 2 TensorCores per chip.
        n_cores = max(n_cores, 2)
        vmem_limit = max(32 * _MIB, min(cap - 8 * _MIB, 56 * _MIB))
        tile_budget = 38 * _MIB
    else:
        # v5e / v6e: 128 MiB physical VMEM, single TensorCore.
        vmem_limit = min(104 * _MIB, cap - 16 * _MIB)
        tile_budget = 72 * _MIB
    return vmem_limit, tile_budget, n_cores >= 2


# ---------------------------------------------------------------------------
# 1) Writeback of the trainable blocks into the frozen full weight.
#    The full weight is aliased input -> output, so only the selected 256x256
#    blocks are DMA'd; untouched regions of the weight stay in place.
# ---------------------------------------------------------------------------
def _writeback_kernel(rows_ref, cols_ref, sel_ref, w_hbm_ref, o_ref):
    del rows_ref, cols_ref, w_hbm_ref  # rows/cols only drive the index_maps
    o_ref[...] = sel_ref[...]


def _writeback_selected_blocks(weight, selected_weight, rows, cols):
    n_out, n_in = weight.shape
    nblk = rows.shape[0]
    assert n_out % Block_dimension == 0 and n_in % Block_dimension == 0
    vmem_limit, _, _ = _tpu_config()
    return pl.pallas_call(
        _writeback_kernel,
        out_shape=jax.ShapeDtypeStruct((n_out, n_in), weight.dtype),
        grid_spec=pltpu.PrefetchScalarGridSpec(
            num_scalar_prefetch=2,          # rows, cols land in SMEM
            grid=(nblk,),
            in_specs=[
                pl.BlockSpec(
                    (Block_dimension, Block_dimension),
                    lambda i, rows, cols: (i, 0),
                ),
                pl.BlockSpec(memory_space=pl.ANY),  # full weight, aliased below
            ],
            out_specs=pl.BlockSpec(
                (Block_dimension, Block_dimension),
                lambda i, rows, cols: (rows[i], cols[i]),
            ),
        ),
        # Call args are (rows, cols, selected_weight, weight): the alias index
        # counts the scalar-prefetch operands, so `weight` is input 3.  Do NOT
        # change this without re-checking -- an off-by-two would silently alias
        # selected_weight instead of weight.
        input_output_aliases={3: 0},
        compiler_params=pltpu.CompilerParams(
            # Keep this axis serialized: duplicate (row, col) entries must keep
            # torch's last-write-wins behavior.
            dimension_semantics=("arbitrary",),
            vmem_limit_bytes=vmem_limit,
        ),
    )(rows, cols, selected_weight, weight)


# ---------------------------------------------------------------------------
# 2) output = x @ weight.T  with weight (N, K) = (out_features, in_features)
# ---------------------------------------------------------------------------
def _xwt_full_k_kernel(x_ref, w_ref, o_ref):
    # x tile (tm, K) . w tile (tn, K) -> (tm, tn); contract on dim 1 of both so
    # no transposed weight tile is materialized (no per-step XLU transpose).
    o_ref[...] = jax.lax.dot_general(
        x_ref[...], w_ref[...],
        dimension_numbers=(((1,), (1,)), ((), ())),
        preferred_element_type=jnp.float32,
    ).astype(o_ref.dtype)


def _xwt_k_tiled_kernel(x_ref, w_ref, o_ref, acc_ref):
    # Large-K fallback: accumulate into a VMEM f32 scratch and cast into the
    # x.dtype output only on the last k step (no f32 HBM output round-trip).
    @pl.when(pl.program_id(2) == 0)
    def _():
        acc_ref[...] = jnp.zeros_like(acc_ref)

    acc_ref[...] += jax.lax.dot_general(
        x_ref[...], w_ref[...],
        dimension_numbers=(((1,), (1,)), ((), ())),
        preferred_element_type=jnp.float32,
    )

    @pl.when(pl.program_id(2) == pl.num_programs(2) - 1)
    def _():
        o_ref[...] = acc_ref[...].astype(o_ref.dtype)


def _select_tiles(M, N, K, itemsize, budget, multi_core):
    """Pick (tm, tn, tk, use_full_k) for the weight-streaming GEMM."""
    # tm: M = B*S is typically tiny -> take it whole; cap only when large.
    tm = M
    if M > 512:
        for cand in (512, 256, 128, 64, 32, 16, 8):
            if M % cand == 0:
                tm = cand
                break

    def full_k_bytes(tn_):
        # double-buffered x + weight input tiles, double-buffered output tile
        return 2 * itemsize * (tm * K + tn_ * K + tm * tn_)

    cands = []
    for c in (N, 4096, 2048, 1024, 512, 256, 128):
        if c <= N and N % c == 0 and c not in cands:
            cands.append(c)

    if multi_core:
        # v7x: prefer an even number of N tiles (>= 4 when possible) so the two
        # TensorCores stream balanced halves of the weight, each pipelined.
        pref4 = [c for c in cands if (N // c) % 2 == 0 and N // c >= 4]
        pref2 = [c for c in cands
                 if (N // c) % 2 == 0 and N // c >= 2 and c not in pref4]
        rest = [c for c in cands if c not in pref4 and c not in pref2]
        ordered = pref4 + pref2 + rest
    else:
        # Single TensorCore: no megacore split to feed -> as wide as fits.
        ordered = cands

    for tn in ordered:
        if full_k_bytes(tn) <= budget:
            return tm, tn, K, True

    # K-tiled fallback: modest tn so tk stays large (keeps per-step DMAs big).
    tn = next((c for c in (512, 256, 128) if N % c == 0), N)
    if multi_core and (N // tn) % 2 != 0:
        for c in (256, 128):
            if N % c == 0 and (N // c) % 2 == 0:
                tn = c
                break

    def k_tiled_bytes(tk_):
        return 2 * itemsize * (tm * tk_ + tn * tk_ + tm * tn) + 4 * tm * tn

    tk = K
    while k_tiled_bytes(tk) > budget and tk % 256 == 0:
        tk //= 2
    return tm, tn, tk, False


def _pallas_x_wt(x2d, weight):
    M, K = x2d.shape
    N, K2 = weight.shape
    assert K == K2
    assert M % 8 == 0 and K % 128 == 0 and N % 128 == 0

    vmem_limit, budget, multi_core = _tpu_config()
    itemsize = jnp.dtype(x2d.dtype).itemsize
    tm, tn, tk, use_full_k = _select_tiles(M, N, K, itemsize, budget, multi_core)

    if use_full_k:
        # No reduction grid axis, no accumulator, no init/finalize gates.
        # Grid order is N-outer / M-inner: the weight block index is constant
        # across the inner axis, so the dominant weight stream is read from HBM
        # exactly once; only the tiny x tiles are re-fetched per N tile.
        return pl.pallas_call(
            _xwt_full_k_kernel,
            out_shape=jax.ShapeDtypeStruct((M, N), x2d.dtype),
            grid_spec=pltpu.PrefetchScalarGridSpec(
                num_scalar_prefetch=0,
                grid=(N // tn, M // tm),
                in_specs=[
                    pl.BlockSpec((tm, K), lambda j, i: (i, 0)),
                    pl.BlockSpec((tn, K), lambda j, i: (j, 0)),
                ],
                out_specs=pl.BlockSpec((tm, tn), lambda j, i: (i, j)),
            ),
            compiler_params=pltpu.CompilerParams(
                dimension_semantics=("parallel", "parallel"),
                vmem_limit_bytes=vmem_limit,
            ),
        )(x2d, weight)

    # Large-K fallback: K grid axis innermost ("arbitrary"), VMEM f32 scratch
    # accumulator, final-step cast directly into the x.dtype output.
    return pl.pallas_call(
        _xwt_k_tiled_kernel,
        out_shape=jax.ShapeDtypeStruct((M, N), x2d.dtype),
        grid_spec=pltpu.PrefetchScalarGridSpec(
            num_scalar_prefetch=0,
            grid=(N // tn, M // tm, K // tk),
            in_specs=[
                pl.BlockSpec((tm, tk), lambda j, i, k: (i, k)),
                pl.BlockSpec((tn, tk), lambda j, i, k: (j, k)),
            ],
            out_specs=pl.BlockSpec((tm, tn), lambda j, i, k: (i, j)),
            scratch_shapes=[pltpu.VMEM((tm, tn), jnp.float32)],
        ),
        compiler_params=pltpu.CompilerParams(
            dimension_semantics=("parallel", "parallel", "arbitrary"),
            vmem_limit_bytes=vmem_limit,
        ),
    )(x2d, weight)


def linear_matrix_sparsity_forward(x, weight, selected_weight, index_list):
    """Equivalent of LinearLayer_MatrixSparsity.forward.

    Returns (output, updated_weight); updated_weight mirrors the in-place
    writeback torch performs on self.weight.data.  Donate `weight` at the jit
    boundary so the writeback aliases in place.  `bias` is unused by the torch
    forward() and is ignored here.
    """
    # --- writeback of the selected blocks (aliased Pallas kernel) ---
    if len(index_list) > 0:
        rows = jnp.asarray([r for r, _ in index_list], dtype=jnp.int32)
        cols = jnp.asarray([c for _, c in index_list], dtype=jnp.int32)
        weight = _writeback_selected_blocks(weight, selected_weight, rows, cols)

    # --- hot path: output = x @ weight.T ---
    B, S, K = x.shape
    N = weight.shape[0]
    x2d = x.reshape(B * S, K)
    M = B * S
    # Sub-32-bit dtypes pack two rows per sublane -> align to 16; else 8.
    align = 8 if jnp.dtype(x2d.dtype).itemsize >= 4 else 16
    pad = (-M) % align
    if pad:
        x2d = jnp.pad(x2d, ((0, pad), (0, 0)))
    out2d = _pallas_x_wt(x2d, weight)
    if pad:
        out2d = out2d[:M]
    # TODO(synk): backward (linearZ.backward) / autograd is not implemented;
    # only the forward pass is translated.
    return out2d.reshape(B, S, N), weight


if __name__ == "__main__":
    key = jax.random.PRNGKey(0)
    k_w, k_sel, k_x = jax.random.split(key, 3)

    # Small shapes consistent with the module: weight is a grid of 256x256 blocks.
    B, S = 2, 8
    in_features = 2 * Block_dimension    # 512
    out_features = 2 * Block_dimension   # 512
    index_list = [(0, 1), (1, 0)]        # (row-block, col-block) pairs

    weight = jax.random.normal(k_w, (out_features, in_features), dtype=jnp.float32) * 0.02
    selected_weight = jax.random.normal(
        k_sel, (len(index_list) * Block_dimension, Block_dimension), dtype=jnp.float32
    ) * 0.02
    x = jax.random.normal(k_x, (B, S, in_features), dtype=jnp.float32)

    # Reference in plain JAX, computed BEFORE the jitted call since `weight` is
    # donated (its buffer is consumed by the in-place block writeback,
    # mirroring torch's self.weight.data[...] = ... semantics).
    ref_w = weight
    for i, (r, c) in enumerate(index_list):
        ref_w = ref_w.at[
            r * Block_dimension:(r + 1) * Block_dimension,
            c * Block_dimension:(c + 1) * Block_dimension,
        ].set(selected_weight[i * Block_dimension:(i + 1) * Block_dimension, :])
    ref = jnp.einsum("bsk,nk->bsn", x, ref_w)
    ref_w, ref = jax.block_until_ready((ref_w, ref))

    fwd = jax.jit(
        functools.partial(linear_matrix_sparsity_forward, index_list=index_list),
        donate_argnums=(1,),   # donate `weight` -> aliased writeback, no HBM copy
    )
    out, updated_weight = fwd(x, weight, selected_weight)
    out = jax.block_until_ready(out)
    updated_weight = jax.block_until_ready(updated_weight)

    assert out.shape == (B, S, out_features)
    assert jnp.allclose(updated_weight, ref_w)
    assert jnp.allclose(out, ref, atol=1e-4, rtol=1e-4)
    print("KERNEL_OK")
</pallas_src>

<mosaic_0001>
module attributes {stable_mosaic.version = 11 : i64} {
  func.func @_writeback_kernel(%arg0: i32, %arg1: memref<2xi32, #tpu.memory_space<smem>>, %arg2: memref<2xi32, #tpu.memory_space<smem>>, %arg3: memref<256x256xf32, #tpu.memory_space<vmem>>, %arg4: memref<512x512xf32, #tpu.memory_space<any>>, %arg5: memref<256x256xf32, #tpu.memory_space<vmem>>) attributes {dimension_semantics = [#tpu.dimension_semantics<arbitrary>], iteration_bounds = array<i64: 2>, scalar_prefetch = 2 : i64, scratch_operands = 0 : i64, tpu.core_type = #tpu.core_type<tc>, window_params = [{transform_indices = @transform_0, window_bounds = array<i64: 256, 256>}, {}, {transform_indices = @transform_2, window_bounds = array<i64: 256, 256>}]} {
    %c0 = arith.constant 0 : index
    %c0_0 = arith.constant 0 : index
    %0 = vector.load %arg3[%c0, %c0_0] : memref<256x256xf32, #tpu.memory_space<vmem>>, vector<256x256xf32>
    %c0_1 = arith.constant 0 : index
    %c0_2 = arith.constant 0 : index
    %1 = vector.load %arg5[%c0_1, %c0_2] : memref<256x256xf32, #tpu.memory_space<vmem>>, vector<256x256xf32>
    tpu.vector_store %arg5[%c0_1, %c0_2], %0 {strides = array<i32>} : memref<256x256xf32, #tpu.memory_space<vmem>>, vector<256x256xf32>,
    return
  }
  func.func @transform_0(%arg0: i32, %arg1: memref<2xi32, #tpu.memory_space<smem>>, %arg2: memref<2xi32, #tpu.memory_space<smem>>) -> (i32, i32) {
    %c0_i32 = arith.constant 0 : i32
    %c0_i32_0 = arith.constant 0 : i32
    return %arg0, %c0_i32 : i32, i32
  }
  func.func @transform_2(%arg0: i32, %arg1: memref<2xi32, #tpu.memory_space<smem>>, %arg2: memref<2xi32, #tpu.memory_space<smem>>) -> (i32, i32) {
    %0 = arith.index_cast %arg0 : i32 to index
    %1 = memref.load %arg1[%0] : memref<2xi32, #tpu.memory_space<smem>>
    %2 = arith.index_cast %arg0 : i32 to index
    %3 = memref.load %arg2[%2] : memref<2xi32, #tpu.memory_space<smem>>
    %c0_i32 = arith.constant 0 : i32
    return %1, %3 : i32, i32
  }
}

module attributes {stable_mosaic.version = 11 : i64} {
  func.func @_xwt_full_k_kernel(%arg0: i32, %arg1: i32, %arg2: memref<16x512xf32, #tpu.memory_space<vmem>>, %arg3: memref<512x512xf32, #tpu.memory_space<vmem>>, %arg4: memref<16x512xf32, #tpu.memory_space<vmem>>) attributes {dimension_semantics = [#tpu.dimension_semantics<parallel>, #tpu.dimension_semantics<parallel>], iteration_bounds = array<i64: 1, 1>, scalar_prefetch = 0 : i64, scratch_operands = 0 : i64, tpu.core_type = #tpu.core_type<tc>, window_params = [{transform_indices = @transform_0, window_bounds = array<i64: 16, 512>}, {transform_indices = @transform_1, window_bounds = array<i64: 512, 512>}, {transform_indices = @transform_2, window_bounds = array<i64: 16, 512>}]} {
    %c0 = arith.constant 0 : index
    %c0_0 = arith.constant 0 : index
    %0 = vector.load %arg2[%c0, %c0_0] : memref<16x512xf32, #tpu.memory_space<vmem>>, vector<16x512xf32>
    %c0_1 = arith.constant 0 : index
    %c0_2 = arith.constant 0 : index
    %1 = vector.load %arg3[%c0_1, %c0_2] : memref<512x512xf32, #tpu.memory_space<vmem>>, vector<512x512xf32>
    %cst = arith.constant dense<0.000000e+00> : vector<16x512xf32>
    %2 = tpu.matmul %0, %1, %cst {dimension_numbers = #tpu.dot_dimension_numbers<[1], [1], [0], [0], [0, 0, 1, 0], [], []>} : vector<16x512xf32>, vector<512x512xf32>, vector<16x512xf32> -> vector<16x512xf32>
    %c0_3 = arith.constant 0 : index
    %c0_4 = arith.constant 0 : index
    %3 = vector.load %arg4[%c0_3, %c0_4] : memref<16x512xf32, #tpu.memory_space<vmem>>, vector<16x512xf32>
    tpu.vector_store %arg4[%c0_3, %c0_4], %2 {strides = array<i32>} : memref<16x512xf32, #tpu.memory_space<vmem>>, vector<16x512xf32>,
    return
  }
  func.func @transform_0(%arg0: i32, %arg1: i32) -> (i32, i32) {
    %c0_i32 = arith.constant 0 : i32
    %c0_i32_0 = arith.constant 0 : i32
    return %arg1, %c0_i32 : i32, i32
  }
  func.func @transform_1(%arg0: i32, %arg1: i32) -> (i32, i32) {
    %c0_i32 = arith.constant 0 : i32
    %c0_i32_0 = arith.constant 0 : i32
    return %arg0, %c0_i32 : i32, i32
  }
  func.func @transform_2(%arg0: i32, %arg1: i32) -> (i32, i32) {
    %c0_i32 = arith.constant 0 : i32
    return %arg1, %arg0 : i32, i32
  }
}

</mosaic_0001>

<bundles_post_ra>
// kernel: linear_matrix_sparsity_forward.2
= control target key start
LH: loop header
LB: loop body
LE: loop exit
PB: predicated region body
PF: predicated region fallthrough
CT: control target
= control target key end

     0   :  { %s1030_s0 = inlined_call_operand.hbm [shape: s32[2], index: 0, kind: input, shape index: {}]   ;;  %s1031_s2 = inlined_call_operand.hbm [shape: f32[512,256], index: 2, kind: input, shape index: {}]   ;;  %s1032_s3 = inlined_call_operand.hbm [shape: f32[512,512], index: 3, kind: input, shape index: {}, may-alias: {3,4}]   ;;  %s1033_s4 = inlined_call_operand.hbm [shape: f32[512,512], index: 4, kind: output, shape index: {}, may-alias: {3,4}]   ;;  %s1034_s1 = inlined_call_operand.hbm [shape: s32[2], index: 1, kind: input, shape index: {}]  }
   0x1   :  { %s480_s17 = scalar_lea.hbm %s1030_s0, 16 }
   0x2   :  { %p481_p0 = scmp.ne.s32.totalorder %s1030_s0, %s480_s17  ;;  %p484_p1 = scmp.lt.u32.totalorder %s480_s17, %s1030_s0 }
   0x4   :  { %p486_p2 = pnand %p484_p1, %p481_p0 }
   0x6   :  { %489 = shalt.err (!%p486_p2)  }
   0x7   :  { %s624_s3 = smov [#allocation3]   ;;  %s490_s26 = scalar_lea.hbm %s1034_s1, 16 }
   0x8   :  { %10 = dma.hbm_to_smem %s1030_s0, 16, %s624_s3, [#allocation2] }
   0x9   :  { %p491_p3 = scmp.ne.s32.totalorder %s1034_s1, %s490_s26  ;;  %p494_p4 = scmp.lt.u32.totalorder %s490_s26, %s1034_s1 }
   0xb   :  { %p496_p5 = pnand %p494_p4, %p491_p3 }
   0xd   :  { %499 = shalt.err (!%p496_p5)  }
   0xe   :  { %s625_s5 = smov [#allocation4]  }
   0xf   :  { %12 = dma.hbm_to_smem %s1034_s1, 16, %s625_s5, [#allocation2] }
  0x10   :  { %586 = dma.done.wait [#allocation2], 32 }
  0x11   :  { %587 = vsyncadd [#allocation2], 4294967264 }
  0x12   :  { %14 = sfence }
  0x13   :  { %15 = vsyncpa [#allocation6], 0 }
  0x14   :  { %17 = vsyncpa [#allocation6 + $0x1], 0 }
  0x15   :  { %18 = vsyncpa [#allocation7], 0 }
  0x16   :  { %20 = vsyncpa [#allocation7 + $0x1], 0  ;;  %s682_s0 = smov 0   ;;  %s684_s8 = smov 0  }
  0x17   :  { %s686_s9 = smov 0   ;;  %s688_s10 = smov 0  }
  0x18   :  { %s690_s11 = smov 0   ;;  %s692_s12 = smov 0  }
  0x19   :  { %s694_s1 = smov 0  }
  0x1a LB: > { %s716_s13 = sadd.s32 4294967295, %s622_s1   ;;  %s379_s14 = sadd.s32 4294967294, %s622_s1   ;;  %s622_s1 = sphi %s694_s1, %s1053_s1   ;;  %s618_s12 = sphi %s692_s12, %s1052_s12   ;;  %s614_s11 = sphi %s690_s11, %s1051_s11   ;;  %s610_s10 = sphi %s688_s10, %s1050_s10   ;;  %s606_s9 = sphi %s686_s9, %s1049_s9   ;;  %s602_s8 = sphi %s684_s8, %s1048_s8   ;;  %s598_s0 = sphi %s682_s0, %s1047_s0  }
  0x1b   : > { %s720_s15 = sadd.s32 1, %s622_s1   ;;  %s33_s16 = sadd.s32 1, %s618_s12 }
  0x1c   : > { %s30_s17 = ssub.s32 %s622_s1, %s720_s15  ;;  %p40_p6 = scmp.ne.s32.totalorder %s618_s12, %s614_s11 }
  0x1d   : > { %p31_p7 = scmp.eq.s32.totalorder %s30_s17, 0  ;;  %p41_p8 = scmp.eq.s32.totalorder %s622_s1, 0 }
  0x1e   : > { %p46_p9 = scmp.ne.s32.totalorder %s614_s11, %s610_s10  ;;  %p47_p10 = scmp.eq.s32.totalorder %s716_s13, 0 }
  0x1f   : > { %s731_s18 = scalar_select %p31_p7, %s618_s12, %s33_s16  }
  0x20   : > { %p733_p11 = por %p41_p8, %p40_p6  ;;  %p737_p12 = por %p47_p10, %p46_p9 }
  0x21   : > { %1036 = sst [smem:[#allocation14_spill]] %s731_s18  ;;  %s65_s24 = sadd.s32 1, %s606_s9 }
  0x22   : > { %s56_s21 = sld [smem:[#allocation3 + %s622_s1]]  ;;  %p75_p13 = scmp.ne.s32.totalorder %s606_s9, %s602_s8 }
  0x23   : > { %s57_s3 = sld [smem:[#allocation4 + %s622_s1]]  ;;  %p76_p0 = scmp.eq.s32.totalorder %s716_s13, 1 }
  0x24   : > { %s58_s22 = sld [smem:[#allocation3 + %s720_s15]]  ;;  %p81_p1 = scmp.ne.s32.totalorder %s602_s8, %s598_s0 }
  0x25   : > { %s59_s23 = sld [smem:[#allocation4 + %s720_s15]]  ;;  %p82_p2 = scmp.eq.s32.totalorder %s379_s14, 1 }
  0x26   : > { %p752_p4 = por %p76_p0, %p75_p13  ;;  %p415_p5 = scmp.lt.s32.totalorder %s622_s1, 2 }
  0x27   : > { %p757_p6 = por %p82_p2, %p81_p1  ;;  %s102_s27 = sand.u32 1, %s618_s12  }
  0x28   : > { %s1039_s25 = scalar_select %p752_p4, 1, 0 }
  0x29   : > { %s1040_s26 = scalar_select %p757_p6, 1, 0 }
  0x2a   : > { %s60_s28 = ssub.s32 %s56_s21, %s58_s22  ;;  %s382_s5 = sshll.u32 %s102_s27, 9 }
  0x2b   : > { %s61_s29 = ssub.s32 %s57_s3, %s59_s23  ;;  %s397_s6 = sshll.u32 %s622_s1, 13 }
  0x2c   : > { %s62_s30 = sor.u32 %s61_s29, %s60_s28  ;;  %s769_s16 = scalar_lea.hbm %s1031_s2, %s397_s6 }
  0x2d   : > { %p63_p7 = scmp.eq.s32.totalorder %s62_s30, 0  ;;  %s106_s17 = scalar_lea.vmem [#allocation5], %s382_s5 }
  0x2e   : > { %s114_s18 = sshll.u32 %s106_s17, 4  ;;  %p777_p8 = pnand %p415_p5, %p733_p11  ;;  %s771_s18 = int_to_ptr.vmem [resolvable:$true] %s114_s18 }
  0x2f   : > { %s764_s7 = scalar_select %p63_p7, %s606_s9, %s65_s24  }
  0x30   : > { %s782_s3 = scalar_lea.sflag [#allocation6], %s102_s27  ;;  %s500_s22 = scalar_lea.hbm %s769_s16, 8192 }
  0x31   : > { %p501_p10 = scmp.ne.s32.totalorder %s769_s16, %s500_s22  ;;  %p502_p13 = pneg %p777_p8 }
  0x32   : > { %s505_s24 = scalar_lea.hbm %s1031_s2, 16384  ;;  %p506_p11 = scmp.lt.u32.totalorder %s769_s16, %s1031_s2 }
  0x33   : > { %p503_p0 = pnand %p502_p13, %p501_p10  ;;  %p507_p2 = scmp.lt.u32.totalorder %s505_s24, %s500_s22 }
  0x34   : > { %p509_p7 = scmp.lt.u32.totalorder %s500_s22, %s769_s16 }
  0x35   : > { %p504_p1 = pneg %p503_p0  ;;  %p508_p5 = por %p507_p2, %p506_p11 }
  0x37   : > { %p510_p3 = por %p509_p7, %p508_p5 }
  0x39   : > { %p511_p9 = pnand %p510_p3, %p504_p1 }
  0x3b   : > { %514 = shalt.err (!%p511_p9)
}
  0x3c   : > { %s515_s27 = scalar_lea.vmem %s771_s18, 8192  ;;  %s626_s30 = smov [#allocation5]  }
  0x3d   : > { %p516_p10 = scmp.ne.s32.totalorder %s771_s18, %s515_s27  ;;  %s520_s5 = sshll.u32 %s626_s30, 4  ;;  %s521_s5 = int_to_ptr.vmem [resolvable:$false] %s520_s5 }
  0x3e   : > { %s522_s6 = scalar_lea.vmem %s521_s5, 16384  ;;  %p523_p4 = scmp.lt.s32.totalorder %s771_s18, %s521_s5 }
  0x3f   : > { %p518_p0 = pnand %p516_p10, %p502_p13  ;;  %p524_p11 = scmp.lt.s32.totalorder %s522_s6, %s515_s27 }
  0x41   : > { %p519_p6 = pneg %p518_p0  ;;  %p525_p2 = por %p524_p11, %p523_p4 }
  0x43   : > { %p526_p5 = pnand %p525_p2, %p519_p6 }
  0x45   : > { %529 = shalt.err (!%p526_p5)
}
  0x46   : > { %s627_s10 = smov 256   ;;  %s628_s14 = smov 16  }
  0x47   : > { %410 = dma.hbm_to_vmem [thread:$0]  (!%p777_p8), %s769_s16, 8192, %s771_s18, %s782_s3, %s627_s10, %s627_s10, %s628_s14  }
  0x48   : > { %p122_p3 = scmp.lt.s32.totalorder %s622_s1, 3  ;;  %p1042_p9 = scmp.ge.s32.totalorder %s622_s1, 1 }
  0x4a   : > { %p123_p13 = pnand %p1042_p9, %p122_p3 }
  0x4b   : > { %s128_s17 = sand.u32 (!%p123_p13), 1, %s614_s11  }
  0x4c   : > { %126 = sbr.rel (%p123_p13) target bundleno = 135 (0x87), region = 24  ;;  %s387_s22 = sshll.u32 (!%p123_p13), %s128_s17, 9 }
  0x4d   : > { %s129_s23 = scalar_lea.sflag (!%p123_p13), [#allocation6], %s128_s17  ;;  %s814_s19 = scalar_lea.vmem (!%p123_p13), [#allocation5], %s387_s22 }
  0x53   : > { %589 = dma.done.wait (%p737_p12), %s129_s23, 8192  }
  0x54   : > { %591 = vsyncadd (%p737_p12), %s129_s23, 4294959104  ;;  %s148_s18 = sand.u32 1, %s602_s8   ;;  %p1043_p4 = scmp.ne.s32.totalorder %s1039_s25, 0  ;;  %v156_v0 = vld [vmem:[%s814_s19] sm:$0xff]  ;;  %v157_v1 = vld [vmem:[%s814_s19 + $0x8] sm:$0xff] }
  0x55   : > { %s388_s16 = sshll.u32 %s148_s18, 9  ;;  %v158_v2 = vld [vmem:[%s814_s19 + $0x10] sm:$0xff]  ;;  %v159_v3 = vld [vmem:[%s814_s19 + $0x18] sm:$0xff]  ;;  %v160_v4 = vld [vmem:[%s814_s19 + $0x20] sm:$0xff]  ;;  %s979_s17 = scalar_lea.sflag [#allocation7], %s148_s18 }
  0x56   : > { %s401_s21 = scalar_select %p1043_p4, [#allocation3], [#allocation9]  ;;  %v161_v5 = vld [vmem:[%s814_s19 + $0x28] sm:$0xff]  ;;  %v162_v6 = vld [vmem:[%s814_s19 + $0x30] sm:$0xff]  ;;  %v163_v7 = vld [vmem:[%s814_s19 + $0x38] sm:$0xff] }
  0x57   : > { %s1055_s13 = smov (!%p1043_p4, %s716_s13), 0  ;;  %s833_s3 = scalar_lea.vmem [#allocation8], %s388_s16  ;;  %v164_v8 = vld [vmem:[%s814_s19 + $0x40] sm:$0xff]  ;;  %v165_v9 = vld [vmem:[%s814_s19 + $0x48] sm:$0xff]  ;;  %v166_v10 = vld [vmem:[%s814_s19 + $0x50] sm:$0xff] }
  0x58   : > { %s403_s20 = scalar_select %p1043_p4, [#allocation4], [#allocation10]  ;;  %220 = vst [vmem:[%s833_s3] sm:$0xff] %v156_v0  ;;  %221 = vst [vmem:[%s833_s3 + $0x8] sm:$0xff] %v157_v1  ;;  %v167_v11 = vld [vmem:[%s814_s19 + $0x58] sm:$0xff]  ;;  %v168_v12 = vld [vmem:[%s814_s19 + $0x60] sm:$0xff] }
  0x59   : > { %222 = vst [vmem:[%s833_s3 + $0x10] sm:$0xff] %v158_v2  ;;  %223 = vst [vmem:[%s833_s3 + $0x18] sm:$0xff] %v159_v3  ;;  %s853_s24 = sld [smem:[%s401_s21 + %s1055_s13]]  ;;  %v169_v13 = vld [vmem:[%s814_s19 + $0x68] sm:$0xff]  ;;  %v170_v14 = vld [vmem:[%s814_s19 + $0x70] sm:$0xff]  ;;  %s303_s30 = sshll.u32 %s833_s3, 4  ;;  %s959_s30 = int_to_ptr.vmem [resolvable:$true] %s303_s30 }
  0x5a   : > { %224 = vst [vmem:[%s833_s3 + $0x20] sm:$0xff] %v160_v4  ;;  %225 = vst [vmem:[%s833_s3 + $0x28] sm:$0xff] %v161_v5  ;;  %s855_s28 = sld [smem:[%s403_s20 + %s1055_s13]]  ;;  %v171_v15 = vld [vmem:[%s814_s19 + $0x78] sm:$0xff]  ;;  %v172_v16 = vld [vmem:[%s814_s19 + $0x80] sm:$0xff]  ;;  %s530_s22 = scalar_lea.vmem %s959_s30, 8192 }
  0x5b   : > { %226 = vst [vmem:[%s833_s3 + $0x30] sm:$0xff] %v162_v6  ;;  %227 = vst [vmem:[%s833_s3 + $0x38] sm:$0xff] %v163_v7  ;;  %v173_v17 = vld [vmem:[%s814_s19 + $0x88] sm:$0xff]  ;;  %v174_v18 = vld [vmem:[%s814_s19 + $0x90] sm:$0xff]  ;;  %p531_p12 = scmp.ne.s32.totalorder %s959_s30, %s530_s22  ;;  %s629_s23 = smov [#allocation8]  }
  0x5c   : > { %228 = vst [vmem:[%s833_s3 + $0x40] sm:$0xff] %v164_v8  ;;  %229 = vst [vmem:[%s833_s3 + $0x48] sm:$0xff] %v165_v9  ;;  %v175_v19 = vld [vmem:[%s814_s19 + $0x98] sm:$0xff]  ;;  %v176_v20 = vld [vmem:[%s814_s19 + $0xa0] sm:$0xff]  ;;  %s534_s16 = sshll.u32 %s629_s23, 4  ;;  %s535_s16 = int_to_ptr.vmem [resolvable:$false] %s534_s16 }
  0x5d   : > { %230 = vst [vmem:[%s833_s3 + $0x50] sm:$0xff] %v166_v10  ;;  %231 = vst [vmem:[%s833_s3 + $0x58] sm:$0xff] %v167_v11  ;;  %v177_v21 = vld [vmem:[%s814_s19 + $0xa8] sm:$0xff]  ;;  %v178_v22 = vld [vmem:[%s814_s19 + $0xb0] sm:$0xff]  ;;  %p532_p6 = pnand %p531_p12, %p1043_p4  ;;  %s536_s21 = scalar_lea.vmem %s535_s16, 16384 }
  0x5e   : > { %232 = vst [vmem:[%s833_s3 + $0x60] sm:$0xff] %v168_v12  ;;  %233 = vst [vmem:[%s833_s3 + $0x68] sm:$0xff] %v169_v13  ;;  %v179_v23 = vld [vmem:[%s814_s19 + $0xb8] sm:$0xff]  ;;  %v180_v24 = vld [vmem:[%s814_s19 + $0xc0] sm:$0xff]  ;;  %p537_p1 = scmp.lt.s32.totalorder %s959_s30, %s535_s16  ;;  %p538_p7 = scmp.lt.s32.totalorder %s536_s21, %s530_s22 }
  0x5f   : > { %234 = vst [vmem:[%s833_s3 + $0x70] sm:$0xff] %v170_v14  ;;  %235 = vst [vmem:[%s833_s3 + $0x78] sm:$0xff] %v171_v15  ;;  %v181_v25 = vld [vmem:[%s814_s19 + $0xc8] sm:$0xff]  ;;  %v182_v26 = vld [vmem:[%s814_s19 + $0xd0] sm:$0xff]  ;;  %s398_s29 = sshll.u32 %s853_s24, 7  ;;  %p533_p8 = pneg %p532_p6 }
  0x60   : > { %236 = vst [vmem:[%s833_s3 + $0x80] sm:$0xff] %v172_v16  ;;  %237 = vst [vmem:[%s833_s3 + $0x88] sm:$0xff] %v173_v17  ;;  %v183_v27 = vld [vmem:[%s814_s19 + $0xd8] sm:$0xff]  ;;  %v184_v28 = vld [vmem:[%s814_s19 + $0xe0] sm:$0xff]  ;;  %s391_s13 = sshll.u32 %s855_s28, 1  ;;  %p539_p10 = por %p538_p7, %p537_p1 }
  0x61   : > { %238 = vst [vmem:[%s833_s3 + $0x90] sm:$0xff] %v174_v18  ;;  %239 = vst [vmem:[%s833_s3 + $0x98] sm:$0xff] %v175_v19  ;;  %v185_v29 = vld [vmem:[%s814_s19 + $0xe8] sm:$0xff]  ;;  %v186_v30 = vld [vmem:[%s814_s19 + $0xf0] sm:$0xff]  ;;  %s925_s27 = sadd.s32 %s398_s29, %s391_s13 }
  0x62   : > { %240 = vst [vmem:[%s833_s3 + $0xa0] sm:$0xff] %v176_v20  ;;  %241 = vst [vmem:[%s833_s3 + $0xa8] sm:$0xff] %v177_v21  ;;  %v187_v31 = vld [vmem:[%s814_s19 + $0xf8] sm:$0xff]  ;;  %v188_v32 = vld [vmem:[%s814_s19 + $0x100] sm:$0xff]  ;;  %s393_s5 = sshll.u32 %s925_s27, 7  ;;  %p540_p0 = pnand %p539_p10, %p533_p8 }
  0x63   : > { %242 = vst [vmem:[%s833_s3 + $0xb0] sm:$0xff] %v178_v22  ;;  %243 = vst [vmem:[%s833_s3 + $0xb8] sm:$0xff] %v179_v23  ;;  %v189_v33 = vld [vmem:[%s814_s19 + $0x108] sm:$0xff]  ;;  %v190_v34 = vld [vmem:[%s814_s19 + $0x110] sm:$0xff]  ;;  %s970_s14 = scalar_lea.hbm %s1033_s4, %s393_s5 }
  0x64   : > { %244 = vst [vmem:[%s833_s3 + $0xc0] sm:$0xff] %v180_v24  ;;  %245 = vst [vmem:[%s833_s3 + $0xc8] sm:$0xff] %v181_v25  ;;  %v191_v35 = vld [vmem:[%s814_s19 + $0x118] sm:$0xff]  ;;  %v192_v36 = vld [vmem:[%s814_s19 + $0x120] sm:$0xff] }
  0x65   : > { %246 = vst [vmem:[%s833_s3 + $0xd0] sm:$0xff] %v182_v26  ;;  %247 = vst [vmem:[%s833_s3 + $0xd8] sm:$0xff] %v183_v27  ;;  %v193_v37 = vld [vmem:[%s814_s19 + $0x128] sm:$0xff]  ;;  %v194_v38 = vld [vmem:[%s814_s19 + $0x130] sm:$0xff] }
  0x66   : > { %248 = vst [vmem:[%s833_s3 + $0xe0] sm:$0xff] %v184_v28  ;;  %249 = vst [vmem:[%s833_s3 + $0xe8] sm:$0xff] %v185_v29  ;;  %v195_v39 = vld [vmem:[%s814_s19 + $0x138] sm:$0xff]  ;;  %v196_v40 = vld [vmem:[%s814_s19 + $0x140] sm:$0xff] }
  0x67   : > { %250 = vst [vmem:[%s833_s3 + $0xf0] sm:$0xff] %v186_v30  ;;  %251 = vst [vmem:[%s833_s3 + $0xf8] sm:$0xff] %v187_v31  ;;  %v197_v41 = vld [vmem:[%s814_s19 + $0x148] sm:$0xff]  ;;  %v198_v42 = vld [vmem:[%s814_s19 + $0x150] sm:$0xff] }
  0x68   : > { %252 = vst [vmem:[%s833_s3 + $0x100] sm:$0xff] %v188_v32  ;;  %253 = vst [vmem:[%s833_s3 + $0x108] sm:$0xff] %v189_v33  ;;  %v199_v43 = vld [vmem:[%s814_s19 + $0x158] sm:$0xff]  ;;  %v200_v44 = vld [vmem:[%s814_s19 + $0x160] sm:$0xff] }
  0x69   : > { %254 = vst [vmem:[%s833_s3 + $0x110] sm:$0xff] %v190_v34  ;;  %255 = vst [vmem:[%s833_s3 + $0x118] sm:$0xff] %v191_v35  ;;  %v201_v45 = vld [vmem:[%s814_s19 + $0x168] sm:$0xff]  ;;  %v202_v46 = vld [vmem:[%s814_s19 + $0x170] sm:$0xff] }
  0x6a   : > { %256 = vst [vmem:[%s833_s3 + $0x120] sm:$0xff] %v192_v36  ;;  %257 = vst [vmem:[%s833_s3 + $0x128] sm:$0xff] %v193_v37  ;;  %v203_v47 = vld [vmem:[%s814_s19 + $0x178] sm:$0xff]  ;;  %v204_v48 = vld [vmem:[%s814_s19 + $0x180] sm:$0xff] }
  0x6b   : > { %258 = vst [vmem:[%s833_s3 + $0x130] sm:$0xff] %v194_v38  ;;  %259 = vst [vmem:[%s833_s3 + $0x138] sm:$0xff] %v195_v39  ;;  %v205_v49 = vld [vmem:[%s814_s19 + $0x188] sm:$0xff]  ;;  %v206_v50 = vld [vmem:[%s814_s19 + $0x190] sm:$0xff] }
  0x6c   : > { %260 = vst [vmem:[%s833_s3 + $0x140] sm:$0xff] %v196_v40  ;;  %261 = vst [vmem:[%s833_s3 + $0x148] sm:$0xff] %v197_v41  ;;  %v207_v51 = vld [vmem:[%s814_s19 + $0x198] sm:$0xff]  ;;  %v208_v52 = vld [vmem:[%s814_s19 + $0x1a0] sm:$0xff] }
  0x6d   : > { %262 = vst [vmem:[%s833_s3 + $0x150] sm:$0xff] %v198_v42  ;;  %263 = vst [vmem:[%s833_s3 + $0x158] sm:$0xff] %v199_v43  ;;  %v209_v53 = vld [vmem:[%s814_s19 + $0x1a8] sm:$0xff]  ;;  %v210_v54 = vld [vmem:[%s814_s19 + $0x1b0] sm:$0xff] }
  0x6e   : > { %264 = vst [vmem:[%s833_s3 + $0x160] sm:$0xff] %v200_v44  ;;  %265 = vst [vmem:[%s833_s3 + $0x168] sm:$0xff] %v201_v45  ;;  %v211_v55 = vld [vmem:[%s814_s19 + $0x1b8] sm:$0xff]  ;;  %v212_v56 = vld [vmem:[%s814_s19 + $0x1c0] sm:$0xff] }
  0x6f   : > { %266 = vst [vmem:[%s833_s3 + $0x170] sm:$0xff] %v202_v46  ;;  %267 = vst [vmem:[%s833_s3 + $0x178] sm:$0xff] %v203_v47  ;;  %v213_v57 = vld [vmem:[%s814_s19 + $0x1c8] sm:$0xff]  ;;  %v214_v58 = vld [vmem:[%s814_s19 + $0x1d0] sm:$0xff] }
  0x70   : > { %268 = vst [vmem:[%s833_s3 + $0x180] sm:$0xff] %v204_v48  ;;  %269 = vst [vmem:[%s833_s3 + $0x188] sm:$0xff] %v205_v49  ;;  %v215_v59 = vld [vmem:[%s814_s19 + $0x1d8] sm:$0xff]  ;;  %v216_v60 = vld [vmem:[%s814_s19 + $0x1e0] sm:$0xff] }
  0x71   : > { %270 = vst [vmem:[%s833_s3 + $0x190] sm:$0xff] %v206_v50  ;;  %271 = vst [vmem:[%s833_s3 + $0x198] sm:$0xff] %v207_v51  ;;  %v217_v61 = vld [vmem:[%s814_s19 + $0x1e8] sm:$0xff]  ;;  %v218_v62 = vld [vmem:[%s814_s19 + $0x1f0] sm:$0xff] }
  0x72   : > { %272 = vst [vmem:[%s833_s3 + $0x1a0] sm:$0xff] %v208_v52  ;;  %273 = vst [vmem:[%s833_s3 + $0x1a8] sm:$0xff] %v209_v53  ;;  %v219_v63 = vld [vmem:[%s814_s19 + $0x1f8] sm:$0xff] }
  0x73   : > { %274 = vst [vmem:[%s833_s3 + $0x1b0] sm:$0xff] %v210_v54  ;;  %275 = vst [vmem:[%s833_s3 + $0x1b8] sm:$0xff] %v211_v55 }
  0x74   : > { %276 = vst [vmem:[%s833_s3 + $0x1c0] sm:$0xff] %v212_v56  ;;  %277 = vst [vmem:[%s833_s3 + $0x1c8] sm:$0xff] %v213_v57 }
  0x75   : > { %278 = vst [vmem:[%s833_s3 + $0x1d0] sm:$0xff] %v214_v58  ;;  %279 = vst [vmem:[%s833_s3 + $0x1d8] sm:$0xff] %v215_v59 }
  0x76   : > { %280 = vst [vmem:[%s833_s3 + $0x1e0] sm:$0xff] %v216_v60  ;;  %281 = vst [vmem:[%s833_s3 + $0x1e8] sm:$0xff] %v217_v61 }
  0x77   : > { %282 = vst [vmem:[%s833_s3 + $0x1f0] sm:$0xff] %v218_v62  ;;  %283 = vst [vmem:[%s833_s3 + $0x1f8] sm:$0xff] %v219_v63 }
  0x78   : > { %543 = shalt.err (!%p540_p0)
}
  0x79   : > { %s544_s19 = scalar_lea.hbm %s970_s14, 8192  ;;  %s548_s3 = scalar_lea.hbm %s1033_s4, 32768 }
  0x7a   : > { %p545_p11 = scmp.ne.s32.totalorder %s970_s14, %s544_s19  ;;  %p549_p3 = scmp.lt.u32.totalorder %s970_s14, %s1033_s4 }
  0x7b   : > { %p550_p9 = scmp.lt.u32.totalorder %s548_s3, %s544_s19  ;;  %p552_p12 = scmp.lt.u32.totalorder %s544_s19, %s970_s14 }
  0x7c   : > { %p546_p2 = pnand %p545_p11, %p1043_p4 }
  0x7d   : > { %p551_p13 = por %p550_p9, %p549_p3 }
  0x7e   : > { %p547_p5 = pneg %p546_p2 }
  0x7f   : > { %p553_p6 = por %p552_p12, %p551_p13 }
  0x81   : > { %p554_p8 = pnand %p553_p6, %p547_p5 }
  0x83   : > { %557 = shalt.err (!%p554_p8)
}
  0x84   : > { %s630_s13 = smov 256   ;;  %s631_s29 = smov 512  }
  0x85   : > { %s632_s27 = smov 16  }
  0x86   : > { %405 = dma.vmem_to_hbm [thread:$0]  (%p1043_p4), %s959_s30, 8192, %s970_s14, %s979_s17, %s630_s13, %s631_s29, %s632_s27  }
  0x87 PF: > { %s318_s5 = sand.u32 1, %s598_s0   ;;  %p1044_p1 = scmp.ne.s32.totalorder %s1040_s26, 0 }
  0x88   : > { %p1045_p7 = scmp.ge.s32.totalorder %s622_s1, 2  ;;  %s319_s6 = scalar_lea.sflag [#allocation7], %s318_s5 }
  0x8a   : > { %p412_p10 = pnand %p1045_p7, %p1044_p1 }
  0x8c   : > { %593 = dma.done.wait (!%p412_p10), %s319_s6, 8192  }
  0x8d   : > { %595 = vsyncadd (!%p412_p10), %s319_s6, 4294959104  ;;  %s1046_s22 = sld [smem:[#allocation14_spill]]  ;;  %p23_p4 = scmp.ge.s32.totalorder %s720_s15, 4  }
  0x8e   : > { %s1047_s0 = smov %s602_s8  ;;  %s1048_s8 = smov %s606_s9 }
  0x8f   : > { %s1049_s9 = smov %s764_s7  ;;  %s1050_s10 = smov %s614_s11 }
  0x90   : > { %s1051_s11 = smov %s618_s12  ;;  %s1053_s1 = smov %s720_s15 }
  0x91   :  { %25 = sbr.rel (!%p23_p4) target bundleno = 26 (0x1a), region = 69 }
  0x93   : > { %s1052_s12 = smov %s1046_s22 }
  0x98   :  { %324 = vsyncpa [#allocation6], 1 }
  0x99   :  { %326 = vsyncpa [#allocation6 + $0x1], 1 }
  0x9a   :  { %327 = vsyncpa [#allocation7], 1 }
  0x9b   :  { %329 = vsyncpa [#allocation7 + $0x1], 1 }

// kernel: linear_matrix_sparsity_forward.3
= control target key start
LH: loop header
LB: loop body
LE: loop exit
PB: predicated region body
PF: predicated region fallthrough
CT: control target
= control target key end

     0   :  { %7 = vsyncpa [#allocation3], 0  ;;  %s1044_s0 = inlined_call_operand.hbm [shape: f32[16,512], index: 0, kind: input, shape index: {}]   ;;  %s1045_s1 = inlined_call_operand.hbm [shape: f32[512,512], index: 1, kind: input, shape index: {}]   ;;  %s1046_s2 = inlined_call_operand.hbm [shape: f32[16,512], index: 2, kind: output, shape index: {}]  }
   0x1   :  { %8 = vsyncpa [#allocation6], 0 }
   0x2   :  { %9 = vsyncpa [#allocation4], 0  ;;  %s979_s9 = smov [#allocation2]   ;;  %s907_s13 = scalar_lea.hbm %s1044_s0, 1024 }
   0x3   :  { %s15_s10 = sshll.u32 %s979_s9, 4  ;;  %p908_p0 = scmp.ne.s32.totalorder %s1044_s0, %s907_s13  ;;  %s16_s10 = int_to_ptr.vmem [resolvable:$true] %s15_s10 }
   0x4   :  { %p911_p1 = scmp.lt.u32.totalorder %s907_s13, %s1044_s0 }
   0x6   :  { %p913_p2 = pnand %p911_p1, %p908_p0 }
   0x8   :  { %916 = shalt.err (!%p913_p2)
}
   0x9   :  { %s917_s18 = scalar_lea.vmem %s16_s10, 1024  ;;  %p922_p4 = scmp.lt.s32.totalorder %s16_s10, %s16_s10 }
   0xa   :  { %p918_p3 = scmp.ne.s32.totalorder %s16_s10, %s917_s18  ;;  %p923_p5 = scmp.lt.s32.totalorder %s917_s18, %s917_s18 }
   0xc   :  { %p924_p6 = por %p923_p5, %p922_p4 }
   0xe   :  { %p925_p7 = pnand %p924_p6, %p918_p3 }
  0x10   :  { %928 = shalt.err (!%p925_p7)
}
  0x11   :  { %s980_s19 = smov 512   ;;  %s981_s20 = smov 32  }
  0x12   :  { %21 = dma.hbm_to_vmem [thread:$0]  %s1044_s0, 1024, %s16_s10, [#allocation3], %s980_s19, %s980_s19, %s981_s20  }
  0x13   :  { %s982_s23 = smov [#allocation5]   ;;  %s929_s27 = scalar_lea.hbm %s1045_s1, 32768 }
  0x14   :  { %s27_s24 = sshll.u32 %s982_s23, 4  ;;  %p930_p8 = scmp.ne.s32.totalorder %s1045_s1, %s929_s27  ;;  %s28_s24 = int_to_ptr.vmem [resolvable:$true] %s27_s24 }
  0x15   :  { %p933_p9 = scmp.lt.u32.totalorder %s929_s27, %s1045_s1 }
  0x17   :  { %p935_p10 = pnand %p933_p9, %p930_p8 }
  0x19   :  { %938 = shalt.err (!%p935_p10)
}
  0x1a   :  { %s939_s4 = scalar_lea.vmem %s28_s24, 32768  ;;  %p944_p12 = scmp.lt.s32.totalorder %s28_s24, %s28_s24 }
  0x1b   :  { %p940_p11 = scmp.ne.s32.totalorder %s28_s24, %s939_s4  ;;  %p945_p13 = scmp.lt.s32.totalorder %s939_s4, %s939_s4 }
  0x1d   :  { %p946_p0 = por %p945_p13, %p944_p12 }
  0x1f   :  { %p947_p1 = pnand %p946_p0, %p940_p11 }
  0x21   :  { %950 = shalt.err (!%p947_p1)
}
  0x22   :  { %33 = dma.hbm_to_vmem [thread:$0]  %s1045_s1, 32768, %s28_s24, [#allocation6], %s980_s19, %s980_s19, %s981_s20  }
  0x23   :  { %973 = dma.done.wait [#allocation3], 1024  }
  0x24   :  { %974 = vsyncadd [#allocation3], 4294966272 }
  0x25   :  { %975 = dma.done.wait [#allocation6], 32768  }
  0x26   :  { %976 = vsyncadd [#allocation6], 4294934528  ;;  %v49_v0 = vld [vmem:[#allocation5 + $0x8] sm:$0xff]  ;;  %v48_v5 = vld [vmem:[#allocation5] sm:$0xff]  ;;  %s983_s1 = smov [#allocation7]  }
  0x27   :  { %v53_v1 = vld [vmem:[#allocation5 + $0x28] sm:$0xff]  ;;  %v52_v6 = vld [vmem:[#allocation5 + $0x20] sm:$0xff]  ;;  %s625_s6 = sshll.u32 %s983_s1, 4  ;;  %s626_s6 = int_to_ptr.vmem [resolvable:$true] %s625_s6 }
  0x28   :  { %v177_v2 = vld [vmem:[#allocation5 + $0x408] sm:$0xff]  ;;  %v638_v3 = vpack.c.bf16 %v53_v1, %v49_v0  ;;  %v640_v8 = vpack.c.bf16 %v52_v6, %v48_v5  ;;  %v176_v9 = vld [vmem:[#allocation5 + $0x400] sm:$0xff]  ;;  %s951_s7 = scalar_lea.vmem %s626_s6, 1024  ;;  %p956_p3 = scmp.lt.s32.totalorder %s626_s6, %s626_s6 }
  0x29   :  { %v181_v4 = vld [vmem:[#allocation5 + $0x428] sm:$0xff]  ;;  %v180_v10 = vld [vmem:[#allocation5 + $0x420] sm:$0xff]  ;;  %p952_p2 = scmp.ne.s32.totalorder %s626_s6, %s951_s7  ;;  %p957_p4 = scmp.lt.s32.totalorder %s951_s7, %s951_s7 }
  0x2a   :  { %v766_v7 = vpack.c.bf16 %v181_v4, %v177_v2  ;;  %v57_v11 = vld [vmem:[#allocation5 + $0x48] sm:$0xff]  ;;  %639 = vmatprep.subr.bf16.mxu0 %v638_v3  ;;  %v768_v12 = vpack.c.bf16 %v180_v10, %v176_v9  ;;  %v56_v18 = vld [vmem:[#allocation5 + $0x40] sm:$0xff] }
  0x2b   :  { %v61_v13 = vld [vmem:[#allocation5 + $0x68] sm:$0xff]  ;;  %641 = vmatpush1.bf16.xpose.msra.mxu0 %v640_v8  ;;  %v60_v19 = vld [vmem:[#allocation5 + $0x60] sm:$0xff]  ;;  %p958_p5 = por %p957_p4, %p956_p3 }
  0x2c   :  { %v185_v14 = vld [vmem:[#allocation5 + $0x448] sm:$0xff]  ;;  %767 = vmatprep.subr.bf16.mxu1 %v766_v7  ;;  %v642_v16 = vpack.c.bf16 %v61_v13, %v57_v11  ;;  %v184_v20 = vld [vmem:[#allocation5 + $0x440] sm:$0xff]  ;;  %v644_v26 = vpack.c.bf16 %v60_v19, %v56_v18 }
  0x2d   :  { %v189_v15 = vld [vmem:[#allocation5 + $0x468] sm:$0xff]  ;;  %769 = vmatpush1.bf16.xpose.msra.mxu1 %v768_v12  ;;  %v188_v21 = vld [vmem:[#allocation5 + $0x460] sm:$0xff]  ;;  %p959_p6 = pnand %p958_p5, %p952_p2 }
  0x2e   :  { %v770_v17 = vpack.c.bf16 %v189_v15, %v185_v14  ;;  %643 = vmatprep.subr.bf16.mxu0 %v642_v16  ;;  %v65_v22 = vld [vmem:[#allocation5 + $0x88] sm:$0xff]  ;;  %v772_v27 = vpack.c.bf16 %v188_v21, %v184_v20  ;;  %v64_v30 = vld [vmem:[#allocation5 + $0x80] sm:$0xff] }
  0x2f   :  { %v69_v23 = vld [vmem:[#allocation5 + $0xa8] sm:$0xff]  ;;  %v68_v31 = vld [vmem:[#allocation5 + $0xa0] sm:$0xff] }
  0x30   :  { %771 = vmatprep.subr.bf16.mxu1 %v770_v17  ;;  %v193_v24 = vld [vmem:[#allocation5 + $0x488] sm:$0xff]  ;;  %v646_v28 = vpack.c.bf16 %v69_v23, %v65_v22  ;;  %v192_v32 = vld [vmem:[#allocation5 + $0x480] sm:$0xff]  ;;  %v648_v38 = vpack.c.bf16 %v68_v31, %v64_v30 }
  0x31   :  { %v197_v25 = vld [vmem:[#allocation5 + $0x4a8] sm:$0xff]  ;;  %v196_v33 = vld [vmem:[#allocation5 + $0x4a0] sm:$0xff] }
  0x32   :  { %v774_v29 = vpack.c.bf16 %v197_v25, %v193_v24  ;;  %v73_v34 = vld [vmem:[#allocation5 + $0xc8] sm:$0xff]  ;;  %v776_v39 = vpack.c.bf16 %v196_v33, %v192_v32  ;;  %v72_v42 = vld [vmem:[#allocation5 + $0xc0] sm:$0xff] }
  0x33   :  { %645 = vmatpush1.bf16.xpose.msra.mxu0 %v644_v26  ;;  %v77_v35 = vld [vmem:[#allocation5 + $0xe8] sm:$0xff]  ;;  %v76_v43 = vld [vmem:[#allocation5 + $0xe0] sm:$0xff] }
  0x34   :  { %647 = vmatprep.subr.bf16.mxu0 %v646_v28  ;;  %v201_v36 = vld [vmem:[#allocation5 + $0x4c8] sm:$0xff]  ;;  %v650_v40 = vpack.c.bf16 %v77_v35, %v73_v34  ;;  %v200_v44 = vld [vmem:[#allocation5 + $0x4c0] sm:$0xff]  ;;  %v652_v50 = vpack.c.bf16 %v76_v43, %v72_v42 }
  0x35   :  { %773 = vmatpush1.bf16.xpose.msra.mxu1 %v772_v27  ;;  %v205_v37 = vld [vmem:[#allocation5 + $0x4e8] sm:$0xff]  ;;  %v204_v45 = vld [vmem:[#allocation5 + $0x4e0] sm:$0xff] }
  0x36   :  { %775 = vmatprep.subr.bf16.mxu1 %v774_v29  ;;  %v778_v41 = vpack.c.bf16 %v205_v37, %v201_v36  ;;  %v81_v46 = vld [vmem:[#allocation5 + $0x108] sm:$0xff]  ;;  %v780_v51 = vpack.c.bf16 %v204_v45, %v200_v44  ;;  %v80_v54 = vld [vmem:[#allocation5 + $0x100] sm:$0xff] }
  0x37   :  { %v85_v47 = vld [vmem:[#allocation5 + $0x128] sm:$0xff]  ;;  %v84_v55 = vld [vmem:[#allocation5 + $0x120] sm:$0xff] }
  0x38   :  { %v209_v48 = vld [vmem:[#allocation5 + $0x508] sm:$0xff]  ;;  %v654_v52 = vpack.c.bf16 %v85_v47, %v81_v46  ;;  %v208_v56 = vld [vmem:[#allocation5 + $0x500] sm:$0xff]  ;;  %v656_v62 = vpack.c.bf16 %v84_v55, %v80_v54 }
  0x39   :  { %v213_v49 = vld [vmem:[#allocation5 + $0x528] sm:$0xff]  ;;  %v212_v57 = vld [vmem:[#allocation5 + $0x520] sm:$0xff] }
  0x3a   :  { %v782_v53 = vpack.c.bf16 %v213_v49, %v209_v48  ;;  %v89_v58 = vld [vmem:[#allocation5 + $0x148] sm:$0xff]  ;;  %v784_v63 = vpack.c.bf16 %v212_v57, %v208_v56  ;;  %v88_v2 = vld [vmem:[#allocation5 + $0x140] sm:$0xff] }
  0x3b   :  { %649 = vmatpush1.bf16.xpose.msra.mxu0 %v648_v38  ;;  %v93_v59 = vld [vmem:[#allocation5 + $0x168] sm:$0xff]  ;;  %v92_v3 = vld [vmem:[#allocation5 + $0x160] sm:$0xff] }
  0x3c   :  { %651 = vmatprep.subr.bf16.mxu0 %v650_v40  ;;  %v217_v60 = vld [vmem:[#allocation5 + $0x548] sm:$0xff]  ;;  %v658_v0 = vpack.c.bf16 %v93_v59, %v89_v58  ;;  %v216_v4 = vld [vmem:[#allocation5 + $0x540] sm:$0xff]  ;;  %v660_v10 = vpack.c.bf16 %v92_v3, %v88_v2 }
  0x3d   :  { %777 = vmatpush1.bf16.xpose.msra.mxu1 %v776_v39  ;;  %v221_v61 = vld [vmem:[#allocation5 + $0x568] sm:$0xff]  ;;  %v220_v5 = vld [vmem:[#allocation5 + $0x560] sm:$0xff] }
  0x3e   :  { %779 = vmatprep.subr.bf16.mxu1 %v778_v41  ;;  %v786_v1 = vpack.c.bf16 %v221_v61, %v217_v60  ;;  %v97_v6 = vld [vmem:[#allocation5 + $0x188] sm:$0xff]  ;;  %v788_v11 = vpack.c.bf16 %v220_v5, %v216_v4  ;;  %v96_v15 = vld [vmem:[#allocation5 + $0x180] sm:$0xff] }
  0x3f   :  { %v101_v7 = vld [vmem:[#allocation5 + $0x1a8] sm:$0xff]  ;;  %v100_v16 = vld [vmem:[#allocation5 + $0x1a0] sm:$0xff] }
  0x40   :  { %v225_v8 = vld [vmem:[#allocation5 + $0x588] sm:$0xff]  ;;  %v662_v12 = vpack.c.bf16 %v101_v7, %v97_v6  ;;  %v224_v17 = vld [vmem:[#allocation5 + $0x580] sm:$0xff]  ;;  %v664_v23 = vpack.c.bf16 %v100_v16, %v96_v15 }
  0x41   :  { %v229_v9 = vld [vmem:[#allocation5 + $0x5a8] sm:$0xff]  ;;  %v228_v18 = vld [vmem:[#allocation5 + $0x5a0] sm:$0xff] }
  0x42   :  { %v790_v13 = vpack.c.bf16 %v229_v9, %v225_v8  ;;  %v41_v14 = vld [vmem:[#allocation2 + $0x8] sm:$0xff]  ;;  %v792_v24 = vpack.c.bf16 %v228_v18, %v224_v17  ;;  %v104_v27 = vld [vmem:[#allocation5 + $0x1c0] sm:$0xff] }
  0x43   :  { %653 = vmatpush1.bf16.xpose.msra.mxu0 %v652_v50  ;;  %368 = vmatprep.mubr.f32.mxu0 %v41_v14  ;;  %v105_v19 = vld [vmem:[#allocation5 + $0x1c8] sm:$0xff]  ;;  %v108_v28 = vld [vmem:[#allocation5 + $0x1e0] sm:$0xff] }
  0x44   :  { %655 = vmatprep.subr.bf16.mxu0 %v654_v52  ;;  %522 = vmatprep.mubr.f32.mxu1 %v41_v14  ;;  %v109_v20 = vld [vmem:[#allocation5 + $0x1e8] sm:$0xff]  ;;  %v232_v29 = vld [vmem:[#allocation5 + $0x5c0] sm:$0xff]  ;;  %v668_v35 = vpack.c.bf16 %v108_v28, %v104_v27 }
  0x45   :  { %781 = vmatpush1.bf16.xpose.msra.mxu1 %v780_v51  ;;  %v233_v21 = vld [vmem:[#allocation5 + $0x5c8] sm:$0xff]  ;;  %v666_v25 = vpack.c.bf16 %v109_v20, %v105_v19  ;;  %v236_v30 = vld [vmem:[#allocation5 + $0x5e0] sm:$0xff] }
  0x46   :  { %783 = vmatprep.subr.bf16.mxu1 %v782_v53  ;;  %v237_v22 = vld [vmem:[#allocation5 + $0x5e8] sm:$0xff]  ;;  %v796_v36 = vpack.c.bf16 %v236_v30, %v232_v29  ;;  %v112_v39 = vld [vmem:[#allocation5 + $0x200] sm:$0xff] }
  0x47   :  { %v794_v26 = vpack.c.bf16 %v237_v22, %v233_v21  ;;  %v113_v31 = vld [vmem:[#allocation5 + $0x208] sm:$0xff]  ;;  %v116_v40 = vld [vmem:[#allocation5 + $0x220] sm:$0xff] }
  0x48   :  { %v117_v32 = vld [vmem:[#allocation5 + $0x228] sm:$0xff]  ;;  %v240_v41 = vld [vmem:[#allocation5 + $0x600] sm:$0xff]  ;;  %v672_v47 = vpack.c.bf16 %v116_v40, %v112_v39 }
  0x49   :  { %v241_v33 = vld [vmem:[#allocation5 + $0x608] sm:$0xff]  ;;  %v670_v37 = vpack.c.bf16 %v117_v32, %v113_v31  ;;  %v244_v42 = vld [vmem:[#allocation5 + $0x620] sm:$0xff] }
  0x4a   :  { %v245_v34 = vld [vmem:[#allocation5 + $0x628] sm:$0xff]  ;;  %v800_v48 = vpack.c.bf16 %v244_v42, %v240_v41  ;;  %v120_v51 = vld [vmem:[#allocation5 + $0x240] sm:$0xff] }
  0x4b   :  { %657 = vmatpush1.bf16.xpose.msra.mxu0 %v656_v62  ;;  %v798_v38 = vpack.c.bf16 %v245_v34, %v241_v33  ;;  %v121_v43 = vld [vmem:[#allocation5 + $0x248] sm:$0xff]  ;;  %v124_v52 = vld [vmem:[#allocation5 + $0x260] sm:$0xff] }
  0x4c   :  { %659 = vmatprep.subr.bf16.mxu0 %v658_v0  ;;  %v125_v44 = vld [vmem:[#allocation5 + $0x268] sm:$0xff]  ;;  %v248_v53 = vld [vmem:[#allocation5 + $0x640] sm:$0xff]  ;;  %v676_v59 = vpack.c.bf16 %v124_v52, %v120_v51 }
  0x4d   :  { %785 = vmatpush1.bf16.xpose.msra.mxu1 %v784_v63  ;;  %v249_v45 = vld [vmem:[#allocation5 + $0x648] sm:$0xff]  ;;  %v674_v49 = vpack.c.bf16 %v125_v44, %v121_v43  ;;  %v252_v54 = vld [vmem:[#allocation5 + $0x660] sm:$0xff] }
  0x4e   :  { %787 = vmatprep.subr.bf16.mxu1 %v786_v1  ;;  %v253_v46 = vld [vmem:[#allocation5 + $0x668] sm:$0xff]  ;;  %v804_v60 = vpack.c.bf16 %v252_v54, %v248_v53  ;;  %v128_v63 = vld [vmem:[#allocation5 + $0x280] sm:$0xff] }
  0x4f   :  { %v802_v50 = vpack.c.bf16 %v253_v46, %v249_v45  ;;  %v129_v55 = vld [vmem:[#allocation5 + $0x288] sm:$0xff]  ;;  %v132_v0 = vld [vmem:[#allocation5 + $0x2a0] sm:$0xff] }
  0x50   :  { %v133_v56 = vld [vmem:[#allocation5 + $0x2a8] sm:$0xff]  ;;  %v256_v1 = vld [vmem:[#allocation5 + $0x680] sm:$0xff]  ;;  %v680_v7 = vpack.c.bf16 %v132_v0, %v128_v63  ;;  %v51_v63 = vld [vmem:[#allocation5 + $0x18] sm:$0xff] }
  0x51   :  { %v257_v57 = vld [vmem:[#allocation5 + $0x688] sm:$0xff]  ;;  %v678_v61 = vpack.c.bf16 %v133_v56, %v129_v55  ;;  %v260_v2 = vld [vmem:[#allocation5 + $0x6a0] sm:$0xff]  ;;  %v55_v0 = vld [vmem:[#allocation5 + $0x38] sm:$0xff] }
  0x52   :  { %v261_v58 = vld [vmem:[#allocation5 + $0x6a8] sm:$0xff]  ;;  %v808_v8 = vpack.c.bf16 %v260_v2, %v256_v1  ;;  %v268_v14 = vld [vmem:[#allocation5 + $0x6e0] sm:$0xff]  ;;  %v179_v1 = vld [vmem:[#allocation5 + $0x418] sm:$0xff] }
  0x53   :  { %661 = vmatpush1.bf16.xpose.msra.mxu0 %v660_v10  ;;  %v806_v62 = vpack.c.bf16 %v261_v58, %v257_v57  ;;  %v137_v3 = vld [vmem:[#allocation5 + $0x2c8] sm:$0xff]  ;;  %v183_v2 = vld [vmem:[#allocation5 + $0x438] sm:$0xff] }
  0x54   :  { %663 = vmatprep.subr.bf16.mxu0 %v662_v12  ;;  %v141_v4 = vld [vmem:[#allocation5 + $0x2e8] sm:$0xff]  ;;  %v140_v12 = vld [vmem:[#allocation5 + $0x2e0] sm:$0xff] }
  0x55   :  { %789 = vmatpush1.bf16.xpose.msra.mxu1 %v788_v11  ;;  %v265_v5 = vld [vmem:[#allocation5 + $0x6c8] sm:$0xff]  ;;  %v682_v9 = vpack.c.bf16 %v141_v4, %v137_v3  ;;  %v136_v11 = vld [vmem:[#allocation5 + $0x2c0] sm:$0xff] }
  0x56   :  { %791 = vmatprep.subr.bf16.mxu1 %v790_v13  ;;  %v269_v6 = vld [vmem:[#allocation5 + $0x6e8] sm:$0xff]  ;;  %v264_v13 = vld [vmem:[#allocation5 + $0x6c0] sm:$0xff]  ;;  %v684_v19 = vpack.c.bf16 %v140_v12, %v136_v11  ;;  %v59_v11 = vld [vmem:[#allocation5 + $0x58] sm:$0xff] }
  0x57   :  { %v810_v10 = vpack.c.bf16 %v269_v6, %v265_v5  ;;  %v145_v15 = vld [vmem:[#allocation5 + $0x308] sm:$0xff]  ;;  %v812_v20 = vpack.c.bf16 %v268_v14, %v264_v13  ;;  %v702_v5 = vpack.c.bf16 %v55_v0, %v51_v63  ;;  %v830_v6 = vpack.c.bf16 %v183_v2, %v179_v1  ;;  %v63_v12 = vld [vmem:[#allocation5 + $0x78] sm:$0xff] }
  0x58   :  { %v149_v16 = vld [vmem:[#allocation5 + $0x328] sm:$0xff]  ;;  %v187_v13 = vld [vmem:[#allocation5 + $0x458] sm:$0xff] }
  0x59   :  { %v273_v17 = vld [vmem:[#allocation5 + $0x708] sm:$0xff]  ;;  %v686_v21 = vpack.c.bf16 %v149_v16, %v145_v15  ;;  %v191_v14 = vld [vmem:[#allocation5 + $0x478] sm:$0xff]  ;;  %v40_v15 = vld [vmem:[#allocation2] sm:$0xff] }
  0x5a   :  { %v277_v18 = vld [vmem:[#allocation5 + $0x728] sm:$0xff]  ;;  %v91_v63 = vld [vmem:[#allocation5 + $0x158] sm:$0xff] }
  0x5b   :  { %665 = vmatpush1.bf16.xpose.msra.mxu0 %v664_v23  ;;  %v814_v22 = vpack.c.bf16 %v277_v18, %v273_v17  ;;  %v144_v23 = vld [vmem:[#allocation5 + $0x300] sm:$0xff]  ;;  %v153_v27 = vld [vmem:[#allocation5 + $0x348] sm:$0xff]  ;;  %v706_v18 = vpack.c.bf16 %v63_v12, %v59_v11  ;;  %v95_v0 = vld [vmem:[#allocation5 + $0x178] sm:$0xff] }
  0x5c   :  { %667 = vmatprep.subr.bf16.mxu0 %v666_v25  ;;  %v272_v25 = vld [vmem:[#allocation5 + $0x700] sm:$0xff]  ;;  %v157_v28 = vld [vmem:[#allocation5 + $0x368] sm:$0xff]  ;;  %v219_v1 = vld [vmem:[#allocation5 + $0x558] sm:$0xff] }
  0x5d   :  { %793 = vmatpush1.bf16.xpose.msra.mxu1 %v792_v24  ;;  %v148_v24 = vld [vmem:[#allocation5 + $0x320] sm:$0xff]  ;;  %v281_v29 = vld [vmem:[#allocation5 + $0x748] sm:$0xff]  ;;  %v690_v33 = vpack.c.bf16 %v157_v28, %v153_v27  ;;  %v67_v27 = vld [vmem:[#allocation5 + $0x98] sm:$0xff] }
  0x5e   :  { %795 = vmatprep.subr.bf16.mxu1 %v794_v26  ;;  %v276_v26 = vld [vmem:[#allocation5 + $0x720] sm:$0xff]  ;;  %v285_v30 = vld [vmem:[#allocation5 + $0x768] sm:$0xff]  ;;  %v688_v31 = vpack.c.bf16 %v148_v24, %v144_v23  ;;  %v62_v23 = vld [vmem:[#allocation5 + $0x70] sm:$0xff] }
  0x5f   :  { %v816_v32 = vpack.c.bf16 %v276_v26, %v272_v25  ;;  %v818_v34 = vpack.c.bf16 %v285_v30, %v281_v29  ;;  %v161_v39 = vld [vmem:[#allocation5 + $0x388] sm:$0xff]  ;;  %v186_v24 = vld [vmem:[#allocation5 + $0x450] sm:$0xff]  ;;  %v43_v25 = vld [vmem:[#allocation2 + $0x18] sm:$0xff] }
  0x60   :  { %v165_v40 = vld [vmem:[#allocation5 + $0x3a8] sm:$0xff]  ;;  %v190_v26 = vld [vmem:[#allocation5 + $0x470] sm:$0xff]  ;;  %v71_v28 = vld [vmem:[#allocation5 + $0xb8] sm:$0xff] }
  0x61   :  { %v289_v41 = vld [vmem:[#allocation5 + $0x788] sm:$0xff]  ;;  %v694_v45 = vpack.c.bf16 %v165_v40, %v161_v39  ;;  %v195_v29 = vld [vmem:[#allocation5 + $0x498] sm:$0xff] }
  0x62   :  { %v293_v42 = vld [vmem:[#allocation5 + $0x7a8] sm:$0xff]  ;;  %v199_v30 = vld [vmem:[#allocation5 + $0x4b8] sm:$0xff] }
  0x63   :  { %669 = vmatpush1.bf16.xpose.msra.mxu0 %v668_v35  ;;  %v152_v35 = vld [vmem:[#allocation5 + $0x340] sm:$0xff]  ;;  %v822_v46 = vpack.c.bf16 %v293_v42, %v289_v41  ;;  %v169_v51 = vld [vmem:[#allocation5 + $0x3c8] sm:$0xff]  ;;  %v75_v39 = vld [vmem:[#allocation5 + $0xd8] sm:$0xff] }
  0x64   :  { %671 = vmatprep.subr.bf16.mxu0 %v670_v37  ;;  %v280_v37 = vld [vmem:[#allocation5 + $0x740] sm:$0xff]  ;;  %v173_v52 = vld [vmem:[#allocation5 + $0x3e8] sm:$0xff]  ;;  %v79_v40 = vld [vmem:[#allocation5 + $0xf8] sm:$0xff] }
  0x65   :  { %797 = vmatpush1.bf16.xpose.msra.mxu1 %v796_v36  ;;  %v156_v36 = vld [vmem:[#allocation5 + $0x360] sm:$0xff]  ;;  %v297_v53 = vld [vmem:[#allocation5 + $0x7c8] sm:$0xff]  ;;  %v698_v57 = vpack.c.bf16 %v173_v52, %v169_v51  ;;  %v203_v41 = vld [vmem:[#allocation5 + $0x4d8] sm:$0xff] }
  0x66   :  { %799 = vmatprep.subr.bf16.mxu1 %v798_v38  ;;  %v284_v38 = vld [vmem:[#allocation5 + $0x760] sm:$0xff]  ;;  %v692_v43 = vpack.c.bf16 %v156_v36, %v152_v35  ;;  %v301_v54 = vld [vmem:[#allocation5 + $0x7e8] sm:$0xff]  ;;  %v66_v35 = vld [vmem:[#allocation5 + $0x90] sm:$0xff] }
  0x67   :  { %v820_v44 = vpack.c.bf16 %v284_v38, %v280_v37  ;;  %v826_v58 = vpack.c.bf16 %v301_v54, %v297_v53  ;;  %v70_v36 = vld [vmem:[#allocation5 + $0xb0] sm:$0xff]  ;;  %v207_v42 = vld [vmem:[#allocation5 + $0x4f8] sm:$0xff] }
  0x68   :  { %v194_v37 = vld [vmem:[#allocation5 + $0x490] sm:$0xff]  ;;  %v83_v51 = vld [vmem:[#allocation5 + $0x118] sm:$0xff] }
  0x69   :  { %v198_v38 = vld [vmem:[#allocation5 + $0x4b0] sm:$0xff]  ;;  %v87_v52 = vld [vmem:[#allocation5 + $0x138] sm:$0xff] }
  0x6a   :  { %v211_v53 = vld [vmem:[#allocation5 + $0x518] sm:$0xff] }
  0x6b   :  { %673 = vmatpush1.bf16.xpose.msra.mxu0 %v672_v47  ;;  %v160_v47 = vld [vmem:[#allocation5 + $0x380] sm:$0xff]  ;;  %v215_v54 = vld [vmem:[#allocation5 + $0x538] sm:$0xff] }
  0x6c   :  { %675 = vmatprep.subr.bf16.mxu0 %v674_v49  ;;  %v288_v49 = vld [vmem:[#allocation5 + $0x780] sm:$0xff]  ;;  %v223_v2 = vld [vmem:[#allocation5 + $0x578] sm:$0xff] }
  0x6d   :  { %801 = vmatpush1.bf16.xpose.msra.mxu1 %v800_v48  ;;  %v164_v48 = vld [vmem:[#allocation5 + $0x3a0] sm:$0xff]  ;;  %v99_v11 = vld [vmem:[#allocation5 + $0x198] sm:$0xff] }
  0x6e   :  { %803 = vmatprep.subr.bf16.mxu1 %v802_v50  ;;  %v292_v50 = vld [vmem:[#allocation5 + $0x7a0] sm:$0xff]  ;;  %v696_v55 = vpack.c.bf16 %v164_v48, %v160_v47  ;;  %v74_v47 = vld [vmem:[#allocation5 + $0xd0] sm:$0xff]  ;;  %v103_v12 = vld [vmem:[#allocation5 + $0x1b8] sm:$0xff] }
  0x6f   :  { %v824_v56 = vpack.c.bf16 %v292_v50, %v288_v49  ;;  %v78_v48 = vld [vmem:[#allocation5 + $0xf0] sm:$0xff] }
  0x70   :  { %v202_v49 = vld [vmem:[#allocation5 + $0x4d0] sm:$0xff] }
  0x71   :  { %v206_v50 = vld [vmem:[#allocation5 + $0x4f0] sm:$0xff] }
  0x73   :  { %677 = vmatpush1.bf16.xpose.msra.mxu0 %v676_v59  ;;  %v168_v59 = vld [vmem:[#allocation5 + $0x3c0] sm:$0xff] }
  0x74   :  { %679 = vmatprep.subr.bf16.mxu0 %v678_v61  ;;  %v296_v61 = vld [vmem:[#allocation5 + $0x7c0] sm:$0xff] }
  0x75   :  { %805 = vmatpush1.bf16.xpose.msra.mxu1 %v804_v60  ;;  %v172_v60 = vld [vmem:[#allocation5 + $0x3e0] sm:$0xff] }
  0x76   :  { %807 = vmatprep.subr.bf16.mxu1 %v806_v62  ;;  %v300_v62 = vld [vmem:[#allocation5 + $0x7e0] sm:$0xff]  ;;  %v700_v3 = vpack.c.bf16 %v172_v60, %v168_v59  ;;  %v82_v59 = vld [vmem:[#allocation5 + $0x110] sm:$0xff] }
  0x77   :  { %v828_v4 = vpack.c.bf16 %v300_v62, %v296_v61  ;;  %v86_v60 = vld [vmem:[#allocation5 + $0x130] sm:$0xff] }
  0x78   :  { %v210_v61 = vld [vmem:[#allocation5 + $0x510] sm:$0xff] }
  0x79   :  { %v214_v62 = vld [vmem:[#allocation5 + $0x530] sm:$0xff] }
  0x7b   :  { %681 = vmatpush1.bf16.xpose.msra.mxu0 %v680_v7  ;;  %v50_v7 = vld [vmem:[#allocation5 + $0x10] sm:$0xff] }
  0x7c   :  { %683 = vmatprep.subr.bf16.mxu0 %v682_v9  ;;  %v178_v9 = vld [vmem:[#allocation5 + $0x410] sm:$0xff] }
  0x7d   :  { %809 = vmatpush1.bf16.xpose.msra.mxu1 %v808_v8  ;;  %v54_v8 = vld [vmem:[#allocation5 + $0x30] sm:$0xff] }
  0x7e   :  { %811 = vmatprep.subr.bf16.mxu1 %v810_v10  ;;  %v182_v10 = vld [vmem:[#allocation5 + $0x430] sm:$0xff]  ;;  %v704_v16 = vpack.c.bf16 %v54_v8, %v50_v7 }
  0x7f   :  { %v832_v17 = vpack.c.bf16 %v182_v10, %v178_v9  ;;  %v90_v7 = vld [vmem:[#allocation5 + $0x150] sm:$0xff] }
  0x80   :  { %v94_v8 = vld [vmem:[#allocation5 + $0x170] sm:$0xff] }
  0x81   :  { %v218_v9 = vld [vmem:[#allocation5 + $0x550] sm:$0xff] }
  0x82   :  { %v222_v10 = vld [vmem:[#allocation5 + $0x570] sm:$0xff] }
  0x83   :  { %685 = vmatpush1.bf16.xpose.msra.mxu0 %v684_v19  ;;  %v834_v19 = vpack.c.bf16 %v191_v14, %v187_v13  ;;  %v227_v13 = vld [vmem:[#allocation5 + $0x598] sm:$0xff] }
  0x84   :  { %687 = vmatprep.subr.bf16.mxu0 %v686_v21  ;;  %v58_v21 = vld [vmem:[#allocation5 + $0x50] sm:$0xff]  ;;  %v231_v14 = vld [vmem:[#allocation5 + $0x5b8] sm:$0xff] }
  0x85   :  { %813 = vmatpush1.bf16.xpose.msra.mxu1 %v812_v20  ;;  %v45_v20 = vld [vmem:[#allocation2 + $0x28] sm:$0xff] }
  0x86   :  { %815 = vmatprep.subr.bf16.mxu1 %v814_v22  ;;  %v44_v22 = vld [vmem:[#allocation2 + $0x20] sm:$0xff] }
  0x8b   :  { %689 = vmatpush1.bf16.xpose.msra.mxu0 %v688_v31  ;;  %v708_v31 = vpack.c.bf16 %v62_v23, %v58_v21  ;;  %v226_v21 = vld [vmem:[#allocation5 + $0x590] sm:$0xff]  ;;  %v107_v23 = vld [vmem:[#allocation5 + $0x1d8] sm:$0xff] }
  0x8c   :  { %691 = vmatprep.subr.bf16.mxu0 %v690_v33  ;;  %v710_v33 = vpack.c.bf16 %v71_v28, %v67_v27 }
  0x8d   :  { %817 = vmatpush1.bf16.xpose.msra.mxu1 %v816_v32  ;;  %v836_v32 = vpack.c.bf16 %v190_v26, %v186_v24  ;;  %v111_v24 = vld [vmem:[#allocation5 + $0x1f8] sm:$0xff] }
  0x8e   :  { %819 = vmatprep.subr.bf16.mxu1 %v818_v34  ;;  %v838_v34 = vpack.c.bf16 %v199_v30, %v195_v29  ;;  %v239_v26 = vld [vmem:[#allocation5 + $0x5f8] sm:$0xff]  ;;  %v730_v29 = vpack.c.bf16 %v111_v24, %v107_v23 }
  0x93   :  { %693 = vmatpush1.bf16.xpose.msra.mxu0 %v692_v43  ;;  %v712_v43 = vpack.c.bf16 %v70_v36, %v66_v35  ;;  %v115_v35 = vld [vmem:[#allocation5 + $0x218] sm:$0xff] }
  0x94   :  { %695 = vmatprep.subr.bf16.mxu0 %v694_v45  ;;  %v714_v45 = vpack.c.bf16 %v79_v40, %v75_v39  ;;  %v119_v36 = vld [vmem:[#allocation5 + $0x238] sm:$0xff] }
  0x95   :  { %821 = vmatpush1.bf16.xpose.msra.mxu1 %v820_v44  ;;  %v840_v44 = vpack.c.bf16 %v198_v38, %v194_v37  ;;  %v243_v37 = vld [vmem:[#allocation5 + $0x618] sm:$0xff] }
  0x96   :  { %823 = vmatprep.subr.bf16.mxu1 %v822_v46  ;;  %v842_v46 = vpack.c.bf16 %v207_v42, %v203_v41  ;;  %v247_v38 = vld [vmem:[#allocation5 + $0x638] sm:$0xff]  ;;  %v734_v41 = vpack.c.bf16 %v119_v36, %v115_v35 }
  0x97   :  { %v862_v42 = vpack.c.bf16 %v247_v38, %v243_v37 }
  0x9b   :  { %697 = vmatpush1.bf16.xpose.msra.mxu0 %v696_v55  ;;  %v716_v55 = vpack.c.bf16 %v78_v48, %v74_v47  ;;  %v123_v47 = vld [vmem:[#allocation5 + $0x258] sm:$0xff] }
  0x9c   :  { %699 = vmatprep.subr.bf16.mxu0 %v698_v57  ;;  %v718_v57 = vpack.c.bf16 %v87_v52, %v83_v51  ;;  %v127_v48 = vld [vmem:[#allocation5 + $0x278] sm:$0xff] }
  0x9d   :  { %825 = vmatpush1.bf16.xpose.msra.mxu1 %v824_v56  ;;  %v844_v56 = vpack.c.bf16 %v206_v50, %v202_v49  ;;  %v251_v49 = vld [vmem:[#allocation5 + $0x658] sm:$0xff] }
  0x9e   :  { %827 = vmatprep.subr.bf16.mxu1 %v826_v58  ;;  %v846_v58 = vpack.c.bf16 %v215_v54, %v211_v53  ;;  %v255_v50 = vld [vmem:[#allocation5 + $0x678] sm:$0xff]  ;;  %v738_v53 = vpack.c.bf16 %v127_v48, %v123_v47 }
  0x9f   :  { %v866_v54 = vpack.c.bf16 %v255_v50, %v251_v49 }
  0xa3   :  { %701 = vmatpush1.bf16.xpose.msra.mxu0 %v700_v3  ;;  %v720_v3 = vpack.c.bf16 %v86_v60, %v82_v59  ;;  %v131_v59 = vld [vmem:[#allocation5 + $0x298] sm:$0xff] }
  0xa4   :  { %703 = vmatprep.subr.bf16.mxu0 %v702_v5  ;;  %v722_v5 = vpack.c.bf16 %v95_v0, %v91_v63  ;;  %v135_v60 = vld [vmem:[#allocation5 + $0x2b8] sm:$0xff] }
  0xa5   :  { %829 = vmatpush1.bf16.xpose.msra.mxu1 %v828_v4  ;;  %v848_v4 = vpack.c.bf16 %v214_v62, %v210_v61  ;;  %v259_v61 = vld [vmem:[#allocation5 + $0x698] sm:$0xff] }
  0xa6   :  { %831 = vmatprep.subr.bf16.mxu1 %v830_v6  ;;  %v850_v6 = vpack.c.bf16 %v223_v2, %v219_v1  ;;  %v263_v62 = vld [vmem:[#allocation5 + $0x6b8] sm:$0xff]  ;;  %v742_v1 = vpack.c.bf16 %v135_v60, %v131_v59 }
  0xa7   :  { %v870_v2 = vpack.c.bf16 %v263_v62, %v259_v61 }
  0xaa   :  { %369 = vmatmul.mubr.f32.vlgmr.msra.gmra.mrb[0].mxu0 %v40_v15 }
  0xab   :  { %705 = vmatpush1.bf16.xpose.msra.mxu0 %v704_v16  ;;  %374 = vmatprep.mubr.f32.mxu0 %v45_v20  ;;  %v852_v16 = vpack.c.bf16 %v222_v10, %v218_v9  ;;  %v267_v9 = vld [vmem:[#allocation5 + $0x6d8] sm:$0xff] }
  0xac   :  { %523 = vmatmul.mubr.f32.vlgmr.msra.gmra.mrb[0].mxu1 %v40_v15  ;;  %707 = vmatprep.subr.bf16.mxu0 %v706_v18  ;;  %v724_v15 = vpack.c.bf16 %v94_v8, %v90_v7  ;;  %v854_v18 = vpack.c.bf16 %v231_v14, %v227_v13  ;;  %v139_v7 = vld [vmem:[#allocation5 + $0x2d8] sm:$0xff] }
  0xad   :  { %833 = vmatpush1.bf16.xpose.msra.mxu1 %v832_v17  ;;  %528 = vmatprep.mubr.f32.mxu1 %v45_v20  ;;  %v726_v17 = vpack.c.bf16 %v103_v12, %v99_v11  ;;  %v102_v20 = vld [vmem:[#allocation5 + $0x1b0] sm:$0xff]  ;;  %v143_v8 = vld [vmem:[#allocation5 + $0x2f8] sm:$0xff] }
  0xae   :  { %835 = vmatprep.subr.bf16.mxu1 %v834_v19  ;;  %375 = vmatmul.mubr.f32.gmra.mrb[2].mxu0 %v44_v22  ;;  %v98_v19 = vld [vmem:[#allocation5 + $0x190] sm:$0xff]  ;;  %v271_v10 = vld [vmem:[#allocation5 + $0x6f8] sm:$0xff]  ;;  %v746_v13 = vpack.c.bf16 %v143_v8, %v139_v7 }
  0xaf   :  { %445 = vmatprep.mubr.f32.mxu0 %v43_v25  ;;  %v728_v27 = vpack.c.bf16 %v102_v20, %v98_v19  ;;  %v874_v14 = vpack.c.bf16 %v271_v10, %v267_v9  ;;  %v147_v19 = vld [vmem:[#allocation5 + $0x318] sm:$0xff]  ;;  %v46_v7 = vld [vmem:[#allocation2 + $0x30] sm:$0xff] }
  0xb0   :  { %529 = vmatmul.mubr.f32.gmra.mrb[2].mxu1 %v44_v22  ;;  %v230_v22 = vld [vmem:[#allocation5 + $0x5b0] sm:$0xff]  ;;  %v151_v20 = vld [vmem:[#allocation5 + $0x338] sm:$0xff] }
  0xb1   :  { %599 = vmatprep.mubr.f32.mxu1 %v43_v25  ;;  %v235_v25 = vld [vmem:[#allocation5 + $0x5d8] sm:$0xff]  ;;  %v856_v28 = vpack.c.bf16 %v230_v22, %v226_v21 }
  0xb2   :  { %v858_v30 = vpack.c.bf16 %v239_v26, %v235_v25  ;;  %v275_v21 = vld [vmem:[#allocation5 + $0x718] sm:$0xff]  ;;  %v750_v25 = vpack.c.bf16 %v151_v20, %v147_v19 }
  0xb3   :  { %709 = vmatpush1.bf16.xpose.msra.mxu0 %v708_v31  ;;  %v106_v31 = vld [vmem:[#allocation5 + $0x1d0] sm:$0xff]  ;;  %v279_v22 = vld [vmem:[#allocation5 + $0x738] sm:$0xff] }
  0xb4   :  { %711 = vmatprep.subr.bf16.mxu0 %v710_v33  ;;  %v234_v33 = vld [vmem:[#allocation5 + $0x5d0] sm:$0xff]  ;;  %v878_v26 = vpack.c.bf16 %v279_v22, %v275_v21 }
  0xb5   :  { %837 = vmatpush1.bf16.xpose.msra.mxu1 %v836_v32  ;;  %v110_v32 = vld [vmem:[#allocation5 + $0x1f0] sm:$0xff] }
  0xb6   :  { %839 = vmatprep.subr.bf16.mxu1 %v838_v34  ;;  %v238_v34 = vld [vmem:[#allocation5 + $0x5f0] sm:$0xff]  ;;  %v732_v39 = vpack.c.bf16 %v110_v32, %v106_v31  ;;  %v155_v31 = vld [vmem:[#allocation5 + $0x358] sm:$0xff] }
  0xb7   :  { %v860_v40 = vpack.c.bf16 %v238_v34, %v234_v33  ;;  %v159_v32 = vld [vmem:[#allocation5 + $0x378] sm:$0xff] }
  0xb8   :  { %v283_v33 = vld [vmem:[#allocation5 + $0x758] sm:$0xff]  ;;  %v754_v37 = vpack.c.bf16 %v159_v32, %v155_v31 }
  0xb9   :  { %v287_v34 = vld [vmem:[#allocation5 + $0x778] sm:$0xff] }
  0xba   :  { %v882_v38 = vpack.c.bf16 %v287_v34, %v283_v33 }
  0xbb   :  { %713 = vmatpush1.bf16.xpose.msra.mxu0 %v712_v43  ;;  %v114_v43 = vld [vmem:[#allocation5 + $0x210] sm:$0xff] }
  0xbc   :  { %715 = vmatprep.subr.bf16.mxu0 %v714_v45  ;;  %v242_v45 = vld [vmem:[#allocation5 + $0x610] sm:$0xff] }
  0xbd   :  { %841 = vmatpush1.bf16.xpose.msra.mxu1 %v840_v44  ;;  %v118_v44 = vld [vmem:[#allocation5 + $0x230] sm:$0xff] }
  0xbe   :  { %843 = vmatprep.subr.bf16.mxu1 %v842_v46  ;;  %v246_v46 = vld [vmem:[#allocation5 + $0x630] sm:$0xff]  ;;  %v736_v51 = vpack.c.bf16 %v118_v44, %v114_v43  ;;  %v163_v43 = vld [vmem:[#allocation5 + $0x398] sm:$0xff] }
  0xbf   :  { %v864_v52 = vpack.c.bf16 %v246_v46, %v242_v45  ;;  %v167_v44 = vld [vmem:[#allocation5 + $0x3b8] sm:$0xff] }
  0xc0   :  { %v291_v45 = vld [vmem:[#allocation5 + $0x798] sm:$0xff]  ;;  %v758_v49 = vpack.c.bf16 %v167_v44, %v163_v43 }
  0xc1   :  { %v295_v46 = vld [vmem:[#allocation5 + $0x7b8] sm:$0xff] }
  0xc2   :  { %v886_v50 = vpack.c.bf16 %v295_v46, %v291_v45 }
  0xc3   :  { %717 = vmatpush1.bf16.xpose.msra.mxu0 %v716_v55  ;;  %v122_v55 = vld [vmem:[#allocation5 + $0x250] sm:$0xff] }
  0xc4   :  { %719 = vmatprep.subr.bf16.mxu0 %v718_v57  ;;  %v250_v57 = vld [vmem:[#allocation5 + $0x650] sm:$0xff] }
  0xc5   :  { %845 = vmatpush1.bf16.xpose.msra.mxu1 %v844_v56  ;;  %v126_v56 = vld [vmem:[#allocation5 + $0x270] sm:$0xff] }
  0xc6   :  { %847 = vmatprep.subr.bf16.mxu1 %v846_v58  ;;  %v254_v58 = vld [vmem:[#allocation5 + $0x670] sm:$0xff]  ;;  %v740_v63 = vpack.c.bf16 %v126_v56, %v122_v55  ;;  %v171_v55 = vld [vmem:[#allocation5 + $0x3d8] sm:$0xff] }
  0xc7   :  { %v868_v0 = vpack.c.bf16 %v254_v58, %v250_v57  ;;  %v175_v56 = vld [vmem:[#allocation5 + $0x3f8] sm:$0xff] }
  0xc8   :  { %v299_v57 = vld [vmem:[#allocation5 + $0x7d8] sm:$0xff]  ;;  %v762_v61 = vpack.c.bf16 %v175_v56, %v171_v55 }
  0xc9   :  { %v303_v58 = vld [vmem:[#allocation5 + $0x7f8] sm:$0xff] }
  0xca   :  { %v890_v62 = vpack.c.bf16 %v303_v58, %v299_v57 }
  0xcb   :  { %721 = vmatpush1.bf16.xpose.msra.mxu0 %v720_v3  ;;  %v130_v3 = vld [vmem:[#allocation5 + $0x290] sm:$0xff] }
  0xcc   :  { %723 = vmatprep.subr.bf16.mxu0 %v722_v5  ;;  %v258_v5 = vld [vmem:[#allocation5 + $0x690] sm:$0xff] }
  0xcd   :  { %849 = vmatpush1.bf16.xpose.msra.mxu1 %v848_v4  ;;  %v134_v4 = vld [vmem:[#allocation5 + $0x2b0] sm:$0xff] }
  0xce   :  { %851 = vmatprep.subr.bf16.mxu1 %v850_v6  ;;  %v262_v6 = vld [vmem:[#allocation5 + $0x6b0] sm:$0xff]  ;;  %v744_v11 = vpack.c.bf16 %v134_v4, %v130_v3 }
  0xcf   :  { %v872_v12 = vpack.c.bf16 %v262_v6, %v258_v5  ;;  %v42_v5 = vld [vmem:[#allocation2 + $0x10] sm:$0xff]  ;;  %v47_v6 = vld [vmem:[#allocation2 + $0x38] sm:$0xff] }
  0xd3   :  { %725 = vmatpush1.bf16.xpose.msra.mxu0 %v724_v15  ;;  %v138_v15 = vld [vmem:[#allocation5 + $0x2d0] sm:$0xff] }
  0xd4   :  { %727 = vmatprep.subr.bf16.mxu0 %v726_v17  ;;  %v266_v17 = vld [vmem:[#allocation5 + $0x6d0] sm:$0xff] }
  0xd5   :  { %853 = vmatpush1.bf16.xpose.msra.mxu1 %v852_v16  ;;  %v142_v16 = vld [vmem:[#allocation5 + $0x2f0] sm:$0xff] }
  0xd6   :  { %855 = vmatprep.subr.bf16.mxu1 %v854_v18  ;;  %v270_v18 = vld [vmem:[#allocation5 + $0x6f0] sm:$0xff]  ;;  %v748_v23 = vpack.c.bf16 %v142_v16, %v138_v15 }
  0xd7   :  { %v876_v24 = vpack.c.bf16 %v270_v18, %v266_v17 }
  0xdb   :  { %729 = vmatpush1.bf16.xpose.msra.mxu0 %v728_v27  ;;  %v146_v27 = vld [vmem:[#allocation5 + $0x310] sm:$0xff] }
  0xdc   :  { %731 = vmatprep.subr.bf16.mxu0 %v730_v29  ;;  %v274_v29 = vld [vmem:[#allocation5 + $0x710] sm:$0xff] }
  0xdd   :  { %857 = vmatpush1.bf16.xpose.msra.mxu1 %v856_v28  ;;  %v150_v28 = vld [vmem:[#allocation5 + $0x330] sm:$0xff] }
  0xde   :  { %859 = vmatprep.subr.bf16.mxu1 %v858_v30  ;;  %v278_v30 = vld [vmem:[#allocation5 + $0x730] sm:$0xff]  ;;  %v752_v35 = vpack.c.bf16 %v150_v28, %v146_v27 }
  0xdf   :  { %v880_v36 = vpack.c.bf16 %v278_v30, %v274_v29 }
  0xe3   :  { %733 = vmatpush1.bf16.xpose.msra.mxu0 %v732_v39  ;;  %v154_v39 = vld [vmem:[#allocation5 + $0x350] sm:$0xff] }
  0xe4   :  { %735 = vmatprep.subr.bf16.mxu0 %v734_v41  ;;  %v282_v41 = vld [vmem:[#allocation5 + $0x750] sm:$0xff] }
  0xe5   :  { %861 = vmatpush1.bf16.xpose.msra.mxu1 %v860_v40  ;;  %v158_v40 = vld [vmem:[#allocation5 + $0x370] sm:$0xff] }
  0xe6   :  { %863 = vmatprep.subr.bf16.mxu1 %v862_v42  ;;  %v286_v42 = vld [vmem:[#allocation5 + $0x770] sm:$0xff]  ;;  %v756_v47 = vpack.c.bf16 %v158_v40, %v154_v39 }
  0xe7   :  { %v884_v48 = vpack.c.bf16 %v286_v42, %v282_v41 }
  0xeb   :  { %737 = vmatpush1.bf16.xpose.msra.mxu0 %v736_v51  ;;  %v162_v51 = vld [vmem:[#allocation5 + $0x390] sm:$0xff] }
  0xec   :  { %739 = vmatprep.subr.bf16.mxu0 %v738_v53  ;;  %v290_v53 = vld [vmem:[#allocation5 + $0x790] sm:$0xff] }
  0xed   :  { %865 = vmatpush1.bf16.xpose.msra.mxu1 %v864_v52  ;;  %v166_v52 = vld [vmem:[#allocation5 + $0x3b0] sm:$0xff] }
  0xee   :  { %867 = vmatprep.subr.bf16.mxu1 %v866_v54  ;;  %v294_v54 = vld [vmem:[#allocation5 + $0x7b0] sm:$0xff]  ;;  %v760_v59 = vpack.c.bf16 %v166_v52, %v162_v51 }
  0xef   :  { %v888_v60 = vpack.c.bf16 %v294_v54, %v290_v53 }
  0xf3   :  { %741 = vmatpush1.bf16.xpose.msra.mxu0 %v740_v63  ;;  %v170_v63 = vld [vmem:[#allocation5 + $0x3d0] sm:$0xff] }
  0xf4   :  { %743 = vmatprep.subr.bf16.mxu0 %v742_v1  ;;  %v298_v1 = vld [vmem:[#allocation5 + $0x7d0] sm:$0xff] }
  0xf5   :  { %869 = vmatpush1.bf16.xpose.msra.mxu1 %v868_v0  ;;  %v174_v0 = vld [vmem:[#allocation5 + $0x3f0] sm:$0xff] }
  0xf6   :  { %871 = vmatprep.subr.bf16.mxu1 %v870_v2  ;;  %v302_v2 = vld [vmem:[#allocation5 + $0x7f0] sm:$0xff]  ;;  %v764_v3 = vpack.c.bf16 %v174_v0, %v170_v63 }
  0xf7   :  { %v892_v4 = vpack.c.bf16 %v302_v2, %v298_v1 }
  0xfb   :  { %745 = vmatpush1.bf16.xpose.msra.mxu0 %v744_v11 }
  0xfc   :  { %747 = vmatprep.subr.bf16.mxu0 %v746_v13 }
  0xfd   :  { %873 = vmatpush1.bf16.xpose.msra.mxu1 %v872_v12 }
  0xfe   :  { %875 = vmatprep.subr.bf16.mxu1 %v874_v14 }
 0x103   :  { %749 = vmatpush1.bf16.xpose.msra.mxu0 %v748_v23 }
 0x104   :  { %751 = vmatprep.subr.bf16.mxu0 %v750_v25 }
 0x105   :  { %877 = vmatpush1.bf16.xpose.msra.mxu1 %v876_v24 }
 0x106   :  { %879 = vmatprep.subr.bf16.mxu1 %v878_v26 }
 0x10b   :  { %753 = vmatpush1.bf16.xpose.msra.mxu0 %v752_v35 }
 0x10c   :  { %755 = vmatprep.subr.bf16.mxu0 %v754_v37 }
 0x10d   :  { %881 = vmatpush1.bf16.xpose.msra.mxu1 %v880_v36 }
 0x10e   :  { %883 = vmatprep.subr.bf16.mxu1 %v882_v38 }
 0x113   :  { %757 = vmatpush1.bf16.xpose.msra.mxu0 %v756_v47 }
 0x114   :  { %759 = vmatprep.subr.bf16.mxu0 %v758_v49 }
 0x115   :  { %885 = vmatpush1.bf16.xpose.msra.mxu1 %v884_v48 }
 0x116   :  { %887 = vmatprep.subr.bf16.mxu1 %v886_v50 }
 0x11b   :  { %761 = vmatpush1.bf16.xpose.msra.mxu0 %v760_v59 }
 0x11c   :  { %763 = vmatprep.subr.bf16.mxu0 %v762_v61 }
 0x11d   :  { %889 = vmatpush1.bf16.xpose.msra.mxu1 %v888_v60 }
 0x11e   :  { %891 = vmatprep.subr.bf16.mxu1 %v890_v62 }
 0x123   :  { %765 = vmatpush1.bf16.xpose.msra.mxu0 %v764_v3 }
 0x125   :  { %893 = vmatpush1.bf16.xpose.msra.mxu1 %v892_v4 }
 0x12a   :  { %446 = vmatmul.mubr.f32.vlgmr.msra.gmra.mrb[0].mxu0 %v42_v5 }
 0x12b   :  { %451 = vmatprep.mubr.f32.mxu0 %v47_v6 }
 0x12c   :  { %600 = vmatmul.mubr.f32.vlgmr.msra.gmra.mrb[0].mxu1 %v42_v5 }
 0x12d   :  { %605 = vmatprep.mubr.f32.mxu1 %v47_v6 }
 0x12e   :  { %452 = vmatmul.mubr.f32.gmra.mrb[2].mxu0 %v46_v7 }
 0x130   :  { %606 = vmatmul.mubr.f32.gmra.mrb[2].mxu1 %v46_v7 }
 0x1fd   :  { %v447_v8 = vpop.f32.mrb[0].mxu0 }
 0x1fe   :  { %612 = vst [vmem:[#allocation7] sm:$0xff] %v447_v8  ;;  %v449_v10 = vpop.f32.mrb[1].mxu0 }
 0x1ff   :  { %v601_v9 = vpop.f32.mrb[0].mxu1  ;;  %613 = vst [vmem:[#allocation7 + $0x8] sm:$0xff] %v449_v10 }
 0x200   :  { %614 = vst [vmem:[#allocation7 + $0x10] sm:$0xff] %v601_v9  ;;  %v603_v11 = vpop.f32.mrb[1].mxu1 }
 0x201   :  { %615 = vst [vmem:[#allocation7 + $0x18] sm:$0xff] %v603_v11  ;;  %v453_v12 = vpop.f32.mrb[2].mxu0 }
 0x202   :  { %616 = vst [vmem:[#allocation7 + $0x20] sm:$0xff] %v453_v12  ;;  %v455_v14 = vpop.f32.mrb[3].mxu0 }
 0x203   :  { %v607_v13 = vpop.f32.mrb[2].mxu1  ;;  %617 = vst [vmem:[#allocation7 + $0x28] sm:$0xff] %v455_v14 }
 0x204   :  { %618 = vst [vmem:[#allocation7 + $0x30] sm:$0xff] %v607_v13  ;;  %v609_v15 = vpop.f32.mrb[3].mxu1 }
 0x205   :  { %619 = vst [vmem:[#allocation7 + $0x38] sm:$0xff] %v609_v15 }
 0x206   :  { %962 = shalt.err (!%p959_p6)
}
 0x207   :  { %s963_s10 = scalar_lea.hbm %s1046_s2, 1024 }
 0x208   :  { %p964_p7 = scmp.ne.s32.totalorder %s1046_s2, %s963_s10  ;;  %p967_p8 = scmp.lt.u32.totalorder %s963_s10, %s1046_s2 }
 0x20a   :  { %p969_p9 = pnand %p967_p8, %p964_p7 }
 0x20c   :  { %972 = shalt.err (!%p969_p9)
}
 0x20d   :  { %631 = dma.vmem_to_hbm [thread:$0]  %s626_s6, 1024, %s1046_s2, [#allocation4], %s980_s19, %s980_s19, %s981_s20  }
 0x20e   :  { %977 = dma.done.wait [#allocation4], 1024  }
 0x20f   :  { %978 = vsyncadd [#allocation4], 4294966272 }
 0x210   :  { %635 = vsyncpa [#allocation3], 1 }
 0x211   :  { %636 = vsyncpa [#allocation6], 1 }
 0x212   :  { %637 = vsyncpa [#allocation4], 1 }

</bundles_post_ra>
